<compile_context>
chip_gen: v7x
topology: tpu7x:2x2x1
jax: 0.10.0
libtpu: 0.0.40
codegen_flags: <defaults>
</compile_context>

<pallas_src>
import functools
import math

import jax
import jax.numpy as jnp
import numpy as np
from jax.experimental import pallas as pl
from jax.experimental.pallas import tpu as pltpu


def _ceil_to(x, m):
    return ((x + m - 1) // m) * m


def _vmem_capacity_bytes():
    """Physical VMEM of the attached TPU; conservative fallback if unknown."""
    try:
        return int(pltpu.get_tpu_info().vmem_capacity_bytes)
    except Exception:
        return 64 << 20  # smallest per-core VMEM across v5e/v6e/v7x


def bert_attention_kernel(x_ref, mask_ref,
                          wq_ref, bq_ref, wkvt_ref, bkvt_ref,
                          wo_ref, bo_ref, gamma_ref, beta_ref,
                          o_ref,
                          k_scratch, v_scratch,
                          *, num_heads, block_q, eps):
    nh = num_heads
    H = wq_ref.shape[0]
    dh = H // nh
    S = x_ref.shape[1]
    mxu = wq_ref.dtype                      # dtype fed to the MXU (bf16 or f32)
    qi = pl.program_id(1)

    # ---- Fused K/V projection, computed ONCE per batch element (qi == 0),
    # directly in transposed / head-major form:
    #   kvT[o, s] = sum_i W_kvT[o, i] * x[s, i]          -> (2H, S)
    # Head split is a free leading-dim reshape; scratch is lane-dense (last
    # dim = S), so no masked per-head slices and no 64->128 lane padding.
    @pl.when(qi == 0)
    def _():
        xf = x_ref[0].astype(mxu)                                    # (S, H)
        kvT = jnp.einsum("oi,si->os", wkvt_ref[...], xf,
                         preferred_element_type=jnp.float32)         # (2H, S)
        kvT = (kvT + bkvt_ref[...]).astype(mxu)
        k_scratch[...] = kvT[:H].reshape(nh, dh, S)                  # (nh, dh, S)
        v_scratch[...] = kvT[H:].reshape(nh, dh, S)                  # (nh, dh, S)

    # ---- Q projection for this query tile (slice from the single full-S x
    # block; 1/sqrt(dh) folded into q). ----
    start = pl.multiple_of(qi * block_q, block_q)
    x_tile = x_ref[0, pl.ds(start, block_q), :]                      # (TQ, H)
    q = jnp.dot(x_tile.astype(mxu), wq_ref[...],
                preferred_element_type=jnp.float32) + bq_ref[0]
    q = (q * (1.0 / math.sqrt(dh))).astype(mxu)
    # Remaining small per-step relayout (O(TQ*H)); kept as lane slices for
    # lowering robustness -- the heavy K/V/ctx relayouts are gone.
    qh = jnp.stack([q[:, h * dh:(h + 1) * dh] for h in range(nh)],
                   axis=0)                                           # (nh, TQ, dh)

    # ---- Scores / softmax (f32), batched over heads; K is already (nh, dh, S)
    # so this is a standard non-transposed batched matmul. ----
    scores = jnp.einsum("hqd,hds->hqs", qh, k_scratch[...],
                        preferred_element_type=jnp.float32)          # (nh, TQ, S)
    scores = scores + mask_ref[0]                                    # (1, S) bcast
    m = jnp.max(scores, axis=-1, keepdims=True)
    p = jnp.exp(scores - m)
    denom = jnp.sum(p, axis=-1, keepdims=True)
    probs = (p * pl.reciprocal(denom, approx=False)).astype(mxu)

    # ---- Context, computed head-major transposed then merged with one free
    # reshape + a single 2D transpose (no per-head lane concat). ----
    ctxT = jnp.einsum("hds,hqs->hdq", v_scratch[...], probs,
                      preferred_element_type=jnp.float32)            # (nh, dh, TQ)
    ctx = ctxT.reshape(H, block_q).T.astype(mxu)                     # (TQ, H)

    # ---- BertSelfOutput: dense -> (+ residual) -> LayerNorm (f32 on VPU). ----
    out = jnp.dot(ctx, wo_ref[...],
                  preferred_element_type=jnp.float32) + bo_ref[0]
    resid = out + x_tile.astype(jnp.float32)
    mu = jnp.mean(resid, axis=-1, keepdims=True)
    var = jnp.mean(jnp.square(resid - mu), axis=-1, keepdims=True)
    normed = (resid - mu) * jax.lax.rsqrt(var + eps)
    o_ref[0] = (normed * gamma_ref[0] + beta_ref[0]).astype(o_ref.dtype)


def bert_attention_pallas(x, mask, params, *, num_heads, eps=1e-12,
                          block_q=None, mxu_dtype=jnp.bfloat16):
    """BertAttention forward.  x: (B,S,H), mask: (B,S) additive."""
    B, S, H = x.shape
    dh = H // num_heads
    assert dh * num_heads == H

    vmem_cap = _vmem_capacity_bytes()

    # block_q: 128 on 64-MiB-VMEM parts (v7x), 256 on 128-MiB parts; pad S so
    # the tile count is exact (padded keys masked, padded query rows dropped).
    if block_q is None:
        block_q = 128 if vmem_cap <= (64 << 20) else 256
    block_q = _ceil_to(min(block_q, _ceil_to(S, 8)), 8)
    S_pad = _ceil_to(S, block_q)
    num_q_tiles = S_pad // block_q

    f32 = jnp.float32
    if S_pad != S:
        x_p = jnp.pad(x, ((0, 0), (0, S_pad - S), (0, 0)))
        mask_p = jnp.pad(mask.astype(f32), ((0, 0), (0, S_pad - S)),
                         constant_values=-1e9)
    else:
        x_p, mask_p = x, mask.astype(f32)
    mask3 = mask_p.reshape(B, 1, S_pad)

    # Weights: W_q / W_o as [H_in, H_out]; K/V fused and pre-transposed to
    # [2*H_out, H_in] so the in-kernel projection lands head-major.
    w_q = params["wq"].astype(mxu_dtype)
    w_o = params["wo"].astype(mxu_dtype)
    w_kvt = jnp.concatenate([params["wk"], params["wv"]], axis=1).T.astype(mxu_dtype)
    b_kvt = jnp.concatenate([params["bk"], params["bv"]],
                            axis=1).reshape(2 * H, 1).astype(f32)
    b_q = params["bq"].astype(f32)
    b_o = params["bo"].astype(f32)
    gamma = params["gamma"].astype(f32)
    beta = params["beta"].astype(f32)

    kernel = functools.partial(bert_attention_kernel, num_heads=num_heads,
                               block_q=block_q, eps=eps)

    # ---- VMEM footprint estimate -> explicit scoped limit.  Always set (covers
    # v5e's 16 MiB default) and capped at physical VMEM minus 16 MiB headroom.
    isz_w = jnp.dtype(mxu_dtype).itemsize
    isz_x = jnp.dtype(x.dtype).itemsize
    weights_b = 4 * H * H * isz_w + 10 * H * 4
    io_b = 2 * (S_pad * H * isz_x + S_pad * 4 + block_q * H * isz_x)
    scratch_b = 2 * H * S_pad * isz_w                       # lane-dense K + V
    inter_b = (2 * H * S_pad * 4                            # kvT (qi==0)
               + 3 * num_heads * block_q * S_pad * 4        # scores/p/probs
               + 8 * block_q * H * 4)                       # q/ctx/out/resid
    vmem_est = int(1.3 * (weights_b + io_b + scratch_b + inter_b))
    vmem_limit = int(min(max(vmem_est, 32 << 20), vmem_cap - (16 << 20)))

    cost = pl.CostEstimate(
        flops=int(8 * B * S_pad * H * H + 4 * B * S_pad * S_pad * H),
        transcendentals=int(B * num_heads * S_pad * S_pad),
        bytes_accessed=int(2 * B * S_pad * H * isz_x + 4 * H * H * isz_w
                           + B * S_pad * 4 + 12 * H * 4),
    )

    def run(single_buffer_consts):
        const_kw = {}
        if single_buffer_consts:
            # Constant-index operands never change across grid steps: single
            # buffer saves ~4*H^2*itemsize of VMEM.
            const_kw = dict(pipeline_mode=pl.Buffered(1))

        def const_spec(shape):
            return pl.BlockSpec(shape, lambda b, qi: (0,) * len(shape), **const_kw)

        grid_spec = pltpu.PrefetchScalarGridSpec(
            num_scalar_prefetch=0,
            grid=(B, num_q_tiles),
            in_specs=[
                pl.BlockSpec((1, S_pad, H), lambda b, qi: (b, 0, 0)),   # x (full S)
                pl.BlockSpec((1, 1, S_pad), lambda b, qi: (b, 0, 0)),   # additive mask
                const_spec((H, H)),                                     # Wq
                const_spec((1, H)),                                     # bq
                const_spec((2 * H, H)),                                 # W_kv^T (fused)
                const_spec((2 * H, 1)),                                 # b_kv^T
                const_spec((H, H)),                                     # Wo
                const_spec((1, H)),                                     # bo
                const_spec((1, H)),                                     # gamma
                const_spec((1, H)),                                     # beta
            ],
            out_specs=pl.BlockSpec((1, block_q, H), lambda b, qi: (b, qi, 0)),
            scratch_shapes=[
                pltpu.VMEM((num_heads, dh, S_pad), mxu_dtype),          # K^T heads
                pltpu.VMEM((num_heads, dh, S_pad), mxu_dtype),          # V^T heads
            ],
        )
        return pl.pallas_call(
            kernel,
            out_shape=jax.ShapeDtypeStruct((B, S_pad, H), x.dtype),
            grid_spec=grid_spec,
            compiler_params=pltpu.CompilerParams(
                # qi must stay "arbitrary": K/V scratch from qi==0 is reused.
                dimension_semantics=("parallel", "arbitrary"),
                vmem_limit_bytes=vmem_limit),
            cost_estimate=cost,
        )(x_p, mask3, w_q, b_q, w_kvt, b_kvt, w_o, b_o, gamma, beta)

    try:
        out = run(True)
    except Exception:
        # Fallback for Pallas builds without single-buffer pipeline_mode support.
        out = run(False)

    return out[:, :S, :] if S_pad != S else out


def bert_attention_ref(x, mask, params, *, num_heads, eps=1e-12):
    """Pure-JAX f32 reference mirroring the PyTorch forward (eval mode)."""
    B, S, H = x.shape
    dh = H // num_heads
    q = x @ params["wq"] + params["bq"][0]
    k = x @ params["wk"] + params["bk"][0]
    v = x @ params["wv"] + params["bv"][0]

    def split(t):  # (B,S,H) -> (B, nh, S, dh)
        return t.reshape(B, S, num_heads, dh).transpose(0, 2, 1, 3)

    qh, kh, vh = split(q), split(k), split(v)
    scores = jnp.einsum("bhqd,bhkd->bhqk", qh, kh) / math.sqrt(dh)
    scores = scores + mask[:, None, None, :]
    probs = jax.nn.softmax(scores, axis=-1)
    ctx = jnp.einsum("bhqk,bhkd->bhqd", probs, vh)
    ctx = ctx.transpose(0, 2, 1, 3).reshape(B, S, H)

    out = ctx @ params["wo"] + params["bo"][0]
    resid = out + x
    mu = jnp.mean(resid, axis=-1, keepdims=True)
    var = jnp.mean((resid - mu) ** 2, axis=-1, keepdims=True)
    normed = (resid - mu) / jnp.sqrt(var + eps)
    return normed * params["gamma"][0] + params["beta"][0]


if __name__ == "__main__":
    B, S, H, NUM_HEADS = 2, 16, 32, 4
    EPS = 1e-12

    key = jax.random.PRNGKey(0)
    ks = jax.random.split(key, 12)

    def winit(k):
        return (0.02 * jax.random.normal(k, (H, H))).astype(jnp.float32)

    def binit(k):
        return (0.02 * jax.random.normal(k, (1, H))).astype(jnp.float32)

    params = {
        "wq": winit(ks[0]), "bq": binit(ks[1]),
        "wk": winit(ks[2]), "bk": binit(ks[3]),
        "wv": winit(ks[4]), "bv": binit(ks[5]),
        "wo": winit(ks[6]), "bo": binit(ks[7]),
        "gamma": jnp.ones((1, H), jnp.float32),
        "beta": jnp.zeros((1, H), jnp.float32),
    }

    x = jax.random.normal(ks[8], (B, S, H), dtype=jnp.float32)
    # Additive BERT-style mask: last two key positions of batch 1 masked out.
    mask = jnp.zeros((B, S), jnp.float32).at[1, -2:].set(-1e4)

    ref = bert_attention_ref(x, mask, params, num_heads=NUM_HEADS, eps=EPS)

    # f32 MXU path, block_q=8 -> 2 query tiles (exercises K/V scratch reuse).
    out_f32 = bert_attention_pallas(x, mask, params, num_heads=NUM_HEADS, eps=EPS,
                                    block_q=8, mxu_dtype=jnp.float32)
    out_f32 = jax.block_until_ready(out_f32)
    np.testing.assert_allclose(np.asarray(out_f32), np.asarray(ref),
                               rtol=1e-2, atol=1e-2)

    # bf16 MXU path (production default): bf16 MXU feeds, f32 accumulation.
    out_bf16 = bert_attention_pallas(x, mask, params, num_heads=NUM_HEADS, eps=EPS,
                                     mxu_dtype=jnp.bfloat16)
    out_bf16 = jax.block_until_ready(out_bf16)
    np.testing.assert_allclose(np.asarray(out_bf16), np.asarray(ref),
                               rtol=6e-2, atol=6e-2)

    # Odd sequence length -> exercises the seq-padding path (padded keys masked).
    S2 = 13
    x2 = x[:, :S2, :]
    mask2 = mask[:, :S2]
    ref2 = bert_attention_ref(x2, mask2, params, num_heads=NUM_HEADS, eps=EPS)
    out2 = bert_attention_pallas(x2, mask2, params, num_heads=NUM_HEADS, eps=EPS,
                                 mxu_dtype=jnp.float32)
    out2 = jax.block_until_ready(out2)
    np.testing.assert_allclose(np.asarray(out2), np.asarray(ref2),
                               rtol=1e-2, atol=1e-2)

    print("KERNEL_OK")
</pallas_src>

<mosaic_0001>
module attributes {stable_mosaic.version = 11 : i64} {
  func.func @bert_attention_kernel(%arg0: i32, %arg1: i32, %arg2: memref<1x16x32xf32, #tpu.memory_space<vmem>>, %arg3: memref<1x1x16xf32, #tpu.memory_space<vmem>>, %arg4: memref<32x32xf32, #tpu.memory_space<vmem>>, %arg5: memref<1x32xf32, #tpu.memory_space<vmem>>, %arg6: memref<64x32xf32, #tpu.memory_space<vmem>>, %arg7: memref<64x1xf32, #tpu.memory_space<vmem>>, %arg8: memref<32x32xf32, #tpu.memory_space<vmem>>, %arg9: memref<1x32xf32, #tpu.memory_space<vmem>>, %arg10: memref<1x32xf32, #tpu.memory_space<vmem>>, %arg11: memref<1x32xf32, #tpu.memory_space<vmem>>, %arg12: memref<1x8x32xf32, #tpu.memory_space<vmem>>, %arg13: memref<4x8x16xf32, #tpu.memory_space<vmem>>, %arg14: memref<4x8x16xf32, #tpu.memory_space<vmem>>) attributes {dimension_semantics = [#tpu.dimension_semantics<parallel>, #tpu.dimension_semantics<arbitrary>], iteration_bounds = array<i64: 2, 2>, scalar_prefetch = 0 : i64, scratch_operands = 2 : i64, tpu.core_type = #tpu.core_type<tc>, window_params = [{transform_indices = @transform_0, window_bounds = array<i64: 1, 16, 32>}, {transform_indices = @transform_1, window_bounds = array<i64: 1, 1, 16>}, {pipeline_mode = #tpu.pipeline_mode<synchronous>, transform_indices = @transform_2, window_bounds = array<i64: 32, 32>}, {pipeline_mode = #tpu.pipeline_mode<synchronous>, transform_indices = @transform_3, window_bounds = array<i64: 1, 32>}, {pipeline_mode = #tpu.pipeline_mode<synchronous>, transform_indices = @transform_4, window_bounds = array<i64: 64, 32>}, {pipeline_mode = #tpu.pipeline_mode<synchronous>, transform_indices = @transform_5, window_bounds = array<i64: 64, 1>}, {pipeline_mode = #tpu.pipeline_mode<synchronous>, transform_indices = @transform_6, window_bounds = array<i64: 32, 32>}, {pipeline_mode = #tpu.pipeline_mode<synchronous>, transform_indices = @transform_7, window_bounds = array<i64: 1, 32>}, {pipeline_mode = #tpu.pipeline_mode<synchronous>, transform_indices = @transform_8, window_bounds = array<i64: 1, 32>}, {pipeline_mode = #tpu.pipeline_mode<synchronous>, transform_indices = @transform_9, window_bounds = array<i64: 1, 32>}, {transform_indices = @transform_10, window_bounds = array<i64: 1, 8, 32>}]} {
    %c0_i32 = arith.constant 0 : i32
    %0 = arith.cmpi eq, %arg1, %c0_i32 : i32
    %1 = arith.extui %0 : i1 to i32
    %c0_i32_0 = arith.constant 0 : i32
    %2 = arith.cmpi ne, %1, %c0_i32_0 : i32
    scf.if %2 {
      %c0_37 = arith.constant 0 : index
      %c0_38 = arith.constant 0 : index
      %c0_39 = arith.constant 0 : index
      %86 = vector.load %arg2[%c0_37, %c0_38, %c0_39] : memref<1x16x32xf32, #tpu.memory_space<vmem>>, vector<1x16x32xf32>
      %87 = vector.shape_cast %86 : vector<1x16x32xf32> to vector<16x32xf32>
      %c0_40 = arith.constant 0 : index
      %c0_41 = arith.constant 0 : index
      %88 = vector.load %arg6[%c0_40, %c0_41] : memref<64x32xf32, #tpu.memory_space<vmem>>, vector<64x32xf32>
      "tpu.trace_start"() <{level = 10 : i32, message = "oi,si->os"}> : () -> ()
      %cst_42 = arith.constant dense<0.000000e+00> : vector<64x16xf32>
      %89 = tpu.matmul %88, %87, %cst_42 {dimension_numbers = #tpu.dot_dimension_numbers<[1], [1], [0], [0], [0, 0, 1, 0], [], []>} : vector<64x32xf32>, vector<16x32xf32>, vector<64x16xf32> -> vector<64x16xf32>
      "tpu.trace_stop"() : () -> ()
      %c0_43 = arith.constant 0 : index
      %c0_44 = arith.constant 0 : index
      %90 = vector.load %arg7[%c0_43, %c0_44] : memref<64x1xf32, #tpu.memory_space<vmem>>, vector<64x1xf32>
      %91 = vector.broadcast %90 : vector<64x1xf32> to vector<64x16xf32>
      %92 = arith.addf %89, %91 : vector<64x16xf32>
      %93 = vector.extract_strided_slice %92 {offsets = [0, 0], sizes = [32, 16], strides = [1, 1]} : vector<64x16xf32> to vector<32x16xf32>
      %94 = vector.shape_cast %93 : vector<32x16xf32> to vector<4x8x16xf32>
      %c0_45 = arith.constant 0 : index
      %c0_46 = arith.constant 0 : index
      %c0_47 = arith.constant 0 : index
      %95 = vector.load %arg13[%c0_45, %c0_46, %c0_47] : memref<4x8x16xf32, #tpu.memory_space<vmem>>, vector<4x8x16xf32>
      tpu.vector_store %arg13[%c0_45, %c0_46, %c0_47], %94 {strides = array<i32>} : memref<4x8x16xf32, #tpu.memory_space<vmem>>, vector<4x8x16xf32>,
      %96 = vector.extract_strided_slice %92 {offsets = [32, 0], sizes = [32, 16], strides = [1, 1]} : vector<64x16xf32> to vector<32x16xf32>
      %97 = vector.shape_cast %96 : vector<32x16xf32> to vector<4x8x16xf32>
      %c0_48 = arith.constant 0 : index
      %c0_49 = arith.constant 0 : index
      %c0_50 = arith.constant 0 : index
      %98 = vector.load %arg14[%c0_48, %c0_49, %c0_50] : memref<4x8x16xf32, #tpu.memory_space<vmem>>, vector<4x8x16xf32>
      tpu.vector_store %arg14[%c0_48, %c0_49, %c0_50], %97 {strides = array<i32>} : memref<4x8x16xf32, #tpu.memory_space<vmem>>, vector<4x8x16xf32>,
    } else {
    }
    %c8_i32 = arith.constant 8 : i32
    %3 = arith.muli %arg1, %c8_i32 : i32
    %4 = tpu.assume_multiple %3, 8 : i32
    %c0 = arith.constant 0 : index
    %5 = arith.index_cast %4 : i32 to index
    %c0_1 = arith.constant 0 : index
    %6 = vector.load %arg2[%c0, %5, %c0_1] : memref<1x16x32xf32, #tpu.memory_space<vmem>>, vector<1x8x32xf32>
    %7 = vector.shape_cast %6 : vector<1x8x32xf32> to vector<8x32xf32>
    %c0_2 = arith.constant 0 : index
    %c0_3 = arith.constant 0 : index
    %8 = vector.load %arg4[%c0_2, %c0_3] : memref<32x32xf32, #tpu.memory_space<vmem>>, vector<32x32xf32>
    %cst = arith.constant dense<0.000000e+00> : vector<8x32xf32>
    %9 = tpu.matmul %7, %8, %cst {dimension_numbers = #tpu.dot_dimension_numbers<[1], [0], [0], [1], [0, 0, 1, 1], [], []>} : vector<8x32xf32>, vector<32x32xf32>, vector<8x32xf32> -> vector<8x32xf32>
    %c0_4 = arith.constant 0 : index
    %c0_5 = arith.constant 0 : index
    %10 = vector.load %arg5[%c0_4, %c0_5] : memref<1x32xf32, #tpu.memory_space<vmem>>, vector<1x32xf32>
    %11 = vector.shape_cast %10 : vector<1x32xf32> to vector<32xf32>
    %12 = vector.shape_cast %11 : vector<32xf32> to vector<1x32xf32>
    %13 = vector.broadcast %12 : vector<1x32xf32> to vector<8x32xf32>
    %14 = arith.addf %9, %13 : vector<8x32xf32>
    %cst_6 = arith.constant 0.353553385 : f32
    %15 = vector.broadcast %cst_6 : f32 to vector<8x32xf32>
    %16 = arith.mulf %14, %15 : vector<8x32xf32>
    %17 = vector.extract_strided_slice %16 {offsets = [0, 0], sizes = [8, 8], strides = [1, 1]} : vector<8x32xf32> to vector<8x8xf32>
    %18 = vector.extract_strided_slice %16 {offsets = [0, 8], sizes = [8, 8], strides = [1, 1]} : vector<8x32xf32> to vector<8x8xf32>
    %19 = vector.extract_strided_slice %16 {offsets = [0, 16], sizes = [8, 8], strides = [1, 1]} : vector<8x32xf32> to vector<8x8xf32>
    %20 = vector.extract_strided_slice %16 {offsets = [0, 24], sizes = [8, 8], strides = [1, 1]} : vector<8x32xf32> to vector<8x8xf32>
    %21 = vector.shape_cast %17 : vector<8x8xf32> to vector<1x8x8xf32>
    %22 = vector.shape_cast %18 : vector<8x8xf32> to vector<1x8x8xf32>
    %23 = vector.shape_cast %19 : vector<8x8xf32> to vector<1x8x8xf32>
    %24 = vector.shape_cast %20 : vector<8x8xf32> to vector<1x8x8xf32>
    %25 = tpu.concatenate %21, %22, %23, %24 in 0 : vector<1x8x8xf32>, vector<1x8x8xf32>, vector<1x8x8xf32>, vector<1x8x8xf32> -> vector<4x8x8xf32>
    %c0_7 = arith.constant 0 : index
    %c0_8 = arith.constant 0 : index
    %c0_9 = arith.constant 0 : index
    %26 = vector.load %arg13[%c0_7, %c0_8, %c0_9] : memref<4x8x16xf32, #tpu.memory_space<vmem>>, vector<4x8x16xf32>
    "tpu.trace_start"() <{level = 10 : i32, message = "hqd,hds->hqs"}> : () -> ()
    %cst_10 = arith.constant dense<0.000000e+00> : vector<4x8x16xf32>
    %27 = tpu.matmul %25, %26, %cst_10 {dimension_numbers = #tpu.dot_dimension_numbers<[2], [1], [1], [2], [0, 0, 0, 1, 1, 2], [0], [0]>} : vector<4x8x8xf32>, vector<4x8x16xf32>, vector<4x8x16xf32> -> vector<4x8x16xf32>
    "tpu.trace_stop"() : () -> ()
    %c0_11 = arith.constant 0 : index
    %c0_12 = arith.constant 0 : index
    %c0_13 = arith.constant 0 : index
    %28 = vector.load %arg3[%c0_11, %c0_12, %c0_13] : memref<1x1x16xf32, #tpu.memory_space<vmem>>, vector<1x1x16xf32>
    %29 = vector.shape_cast %28 : vector<1x1x16xf32> to vector<1x16xf32>
    %30 = vector.shape_cast %29 : vector<1x16xf32> to vector<1x1x16xf32>
    %31 = vector.broadcast %30 : vector<1x1x16xf32> to vector<4x8x16xf32>
    %32 = arith.addf %27, %31 : vector<4x8x16xf32>
    %cst_14 = arith.constant dense<0xFF800000> : vector<4x8xf32>
    %33 = vector.multi_reduction <maximumf>, %32, %cst_14 [2] : vector<4x8x16xf32> to vector<4x8xf32>
    %34 = vector.shape_cast %33 : vector<4x8xf32> to vector<4x8x1xf32>
    %35 = vector.broadcast %34 : vector<4x8x1xf32> to vector<4x8x16xf32>
    %36 = arith.subf %32, %35 : vector<4x8x16xf32>
    %37 = math.exp %36 : vector<4x8x16xf32>
    %cst_15 = arith.constant dense<0.000000e+00> : vector<4x8xf32>
    %38 = vector.multi_reduction <add>, %37, %cst_15 [2] : vector<4x8x16xf32> to vector<4x8xf32>
    %39 = vector.shape_cast %38 : vector<4x8xf32> to vector<4x8x1xf32>
    %40 = tpu.reciprocal %39 : vector<4x8x1xf32> -> vector<4x8x1xf32>
    %41 = vector.broadcast %40 : vector<4x8x1xf32> to vector<4x8x16xf32>
    %42 = arith.mulf %37, %41 : vector<4x8x16xf32>
    %c0_16 = arith.constant 0 : index
    %c0_17 = arith.constant 0 : index
    %c0_18 = arith.constant 0 : index
    %43 = vector.load %arg14[%c0_16, %c0_17, %c0_18] : memref<4x8x16xf32, #tpu.memory_space<vmem>>, vector<4x8x16xf32>
    "tpu.trace_start"() <{level = 10 : i32, message = "hds,hqs->hdq"}> : () -> ()
    %cst_19 = arith.constant dense<0.000000e+00> : vector<4x8x8xf32>
    %44 = tpu.matmul %43, %42, %cst_19 {dimension_numbers = #tpu.dot_dimension_numbers<[2], [2], [1], [1], [0, 0, 0, 1, 1, 1], [0], [0]>} : vector<4x8x16xf32>, vector<4x8x16xf32>, vector<4x8x8xf32> -> vector<4x8x8xf32>
    "tpu.trace_stop"() : () -> ()
    %45 = vector.shape_cast %44 : vector<4x8x8xf32> to vector<32x8xf32>
    %46 = tpu.transpose %45, [1, 0] : vector<32x8xf32> -> vector<8x32xf32>
    %c0_20 = arith.constant 0 : index
    %c0_21 = arith.constant 0 : index
    %47 = vector.load %arg8[%c0_20, %c0_21] : memref<32x32xf32, #tpu.memory_space<vmem>>, vector<32x32xf32>
    %cst_22 = arith.constant dense<0.000000e+00> : vector<8x32xf32>
    %48 = tpu.matmul %46, %47, %cst_22 {dimension_numbers = #tpu.dot_dimension_numbers<[1], [0], [0], [1], [0, 0, 1, 1], [], []>} : vector<8x32xf32>, vector<32x32xf32>, vector<8x32xf32> -> vector<8x32xf32>
    %c0_23 = arith.constant 0 : index
    %c0_24 = arith.constant 0 : index
    %49 = vector.load %arg9[%c0_23, %c0_24] : memref<1x32xf32, #tpu.memory_space<vmem>>, vector<1x32xf32>
    %50 = vector.shape_cast %49 : vector<1x32xf32> to vector<32xf32>
    %51 = vector.shape_cast %50 : vector<32xf32> to vector<1x32xf32>
    %52 = vector.broadcast %51 : vector<1x32xf32> to vector<8x32xf32>
    %53 = arith.addf %48, %52 : vector<8x32xf32>
    %54 = arith.addf %53, %7 : vector<8x32xf32>
    %cst_25 = arith.constant dense<0.000000e+00> : vector<8xf32>
    %55 = vector.multi_reduction <add>, %54, %cst_25 [1] : vector<8x32xf32> to vector<8xf32>
    %56 = vector.shape_cast %55 : vector<8xf32> to vector<8x1xf32>
    %cst_26 = arith.constant 3.200000e+01 : f32
    %57 = vector.broadcast %cst_26 : f32 to vector<8x1xf32>
    %58 = arith.divf %56, %57 : vector<8x1xf32>
    %59 = vector.broadcast %58 : vector<8x1xf32> to vector<8x32xf32>
    %60 = arith.subf %54, %59 : vector<8x32xf32>
    %61 = arith.mulf %60, %60 : vector<8x32xf32>
    %cst_27 = arith.constant dense<0.000000e+00> : vector<8xf32>
    %62 = vector.multi_reduction <add>, %61, %cst_27 [1] : vector<8x32xf32> to vector<8xf32>
    %63 = vector.shape_cast %62 : vector<8xf32> to vector<8x1xf32>
    %cst_28 = arith.constant 3.200000e+01 : f32
    %64 = vector.broadcast %cst_28 : f32 to vector<8x1xf32>
    %65 = arith.divf %63, %64 : vector<8x1xf32>
    %66 = vector.broadcast %58 : vector<8x1xf32> to vector<8x32xf32>
    %67 = arith.subf %54, %66 : vector<8x32xf32>
    %cst_29 = arith.constant 9.99999996E-13 : f32
    %68 = vector.broadcast %cst_29 : f32 to vector<8x1xf32>
    %69 = arith.addf %65, %68 : vector<8x1xf32>
    %70 = math.rsqrt %69 : vector<8x1xf32>
    %71 = vector.broadcast %70 : vector<8x1xf32> to vector<8x32xf32>
    %72 = arith.mulf %67, %71 : vector<8x32xf32>
    %c0_30 = arith.constant 0 : index
    %c0_31 = arith.constant 0 : index
    %73 = vector.load %arg10[%c0_30, %c0_31] : memref<1x32xf32, #tpu.memory_space<vmem>>, vector<1x32xf32>
    %74 = vector.shape_cast %73 : vector<1x32xf32> to vector<32xf32>
    %75 = vector.shape_cast %74 : vector<32xf32> to vector<1x32xf32>
    %76 = vector.broadcast %75 : vector<1x32xf32> to vector<8x32xf32>
    %77 = arith.mulf %72, %76 : vector<8x32xf32>
    %c0_32 = arith.constant 0 : index
    %c0_33 = arith.constant 0 : index
    %78 = vector.load %arg11[%c0_32, %c0_33] : memref<1x32xf32, #tpu.memory_space<vmem>>, vector<1x32xf32>
    %79 = vector.shape_cast %78 : vector<1x32xf32> to vector<32xf32>
    %80 = vector.shape_cast %79 : vector<32xf32> to vector<1x32xf32>
    %81 = vector.broadcast %80 : vector<1x32xf32> to vector<8x32xf32>
    %82 = arith.addf %77, %81 : vector<8x32xf32>
    %c0_34 = arith.constant 0 : index
    %c0_35 = arith.constant 0 : index
    %c0_36 = arith.constant 0 : index
    %83 = vector.load %arg12[%c0_34, %c0_35, %c0_36] : memref<1x8x32xf32, #tpu.memory_space<vmem>>, vector<1x8x32xf32>
    %84 = vector.shape_cast %83 : vector<1x8x32xf32> to vector<8x32xf32>
    %85 = vector.shape_cast %82 : vector<8x32xf32> to vector<1x8x32xf32>
    tpu.vector_store %arg12[%c0_34, %c0_35, %c0_36], %85 {strides = array<i32>} : memref<1x8x32xf32, #tpu.memory_space<vmem>>, vector<1x8x32xf32>,
    return
  }
  func.func @transform_0(%arg0: i32, %arg1: i32) -> (i32, i32, i32) {
    %c0_i32 = arith.constant 0 : i32
    %c0_i32_0 = arith.constant 0 : i32
    %c0_i32_1 = arith.constant 0 : i32
    return %arg0, %c0_i32, %c0_i32_0 : i32, i32, i32
  }
  func.func @transform_1(%arg0: i32, %arg1: i32) -> (i32, i32, i32) {
    %c0_i32 = arith.constant 0 : i32
    %c0_i32_0 = arith.constant 0 : i32
    %c0_i32_1 = arith.constant 0 : i32
    return %arg0, %c0_i32, %c0_i32_0 : i32, i32, i32
  }
  func.func @transform_2(%arg0: i32, %arg1: i32) -> (i32, i32) {
    %c0_i32 = arith.constant 0 : i32
    %c0_i32_0 = arith.constant 0 : i32
    %c0_i32_1 = arith.constant 0 : i32
    return %c0_i32, %c0_i32_0 : i32, i32
  }
  func.func @transform_3(%arg0: i32, %arg1: i32) -> (i32, i32) {
    %c0_i32 = arith.constant 0 : i32
    %c0_i32_0 = arith.constant 0 : i32
    %c0_i32_1 = arith.constant 0 : i32
    return %c0_i32, %c0_i32_0 : i32, i32
  }
  func.func @transform_4(%arg0: i32, %arg1: i32) -> (i32, i32) {
    %c0_i32 = arith.constant 0 : i32
    %c0_i32_0 = arith.constant 0 : i32
    %c0_i32_1 = arith.constant 0 : i32
    return %c0_i32, %c0_i32_0 : i32, i32
  }
  func.func @transform_5(%arg0: i32, %arg1: i32) -> (i32, i32) {
    %c0_i32 = arith.constant 0 : i32
    %c0_i32_0 = arith.constant 0 : i32
    %c0_i32_1 = arith.constant 0 : i32
    return %c0_i32, %c0_i32_0 : i32, i32
  }
  func.func @transform_6(%arg0: i32, %arg1: i32) -> (i32, i32) {
    %c0_i32 = arith.constant 0 : i32
    %c0_i32_0 = arith.constant 0 : i32
    %c0_i32_1 = arith.constant 0 : i32
    return %c0_i32, %c0_i32_0 : i32, i32
  }
  func.func @transform_7(%arg0: i32, %arg1: i32) -> (i32, i32) {
    %c0_i32 = arith.constant 0 : i32
    %c0_i32_0 = arith.constant 0 : i32
    %c0_i32_1 = arith.constant 0 : i32
    return %c0_i32, %c0_i32_0 : i32, i32
  }
  func.func @transform_8(%arg0: i32, %arg1: i32) -> (i32, i32) {
    %c0_i32 = arith.constant 0 : i32
    %c0_i32_0 = arith.constant 0 : i32
    %c0_i32_1 = arith.constant 0 : i32
    return %c0_i32, %c0_i32_0 : i32, i32
  }
  func.func @transform_9(%arg0: i32, %arg1: i32) -> (i32, i32) {
    %c0_i32 = arith.constant 0 : i32
    %c0_i32_0 = arith.constant 0 : i32
    %c0_i32_1 = arith.constant 0 : i32
    return %c0_i32, %c0_i32_0 : i32, i32
  }
  func.func @transform_10(%arg0: i32, %arg1: i32) -> (i32, i32, i32) {
    %c0_i32 = arith.constant 0 : i32
    %c0_i32_0 = arith.constant 0 : i32
    return %arg0, %arg1, %c0_i32 : i32, i32, i32
  }
}

module attributes {stable_mosaic.version = 11 : i64} {
  func.func @bert_attention_kernel(%arg0: i32, %arg1: i32, %arg2: memref<1x16x32xf32, #tpu.memory_space<vmem>>, %arg3: memref<1x1x16xf32, #tpu.memory_space<vmem>>, %arg4: memref<32x32xf32, #tpu.memory_space<vmem>>, %arg5: memref<1x32xf32, #tpu.memory_space<vmem>>, %arg6: memref<64x32xf32, #tpu.memory_space<vmem>>, %arg7: memref<64x1xf32, #tpu.memory_space<vmem>>, %arg8: memref<32x32xf32, #tpu.memory_space<vmem>>, %arg9: memref<1x32xf32, #tpu.memory_space<vmem>>, %arg10: memref<1x32xf32, #tpu.memory_space<vmem>>, %arg11: memref<1x32xf32, #tpu.memory_space<vmem>>, %arg12: memref<1x8x32xf32, #tpu.memory_space<vmem>>, %arg13: memref<4x8x16xf32, #tpu.memory_space<vmem>>, %arg14: memref<4x8x16xf32, #tpu.memory_space<vmem>>) attributes {dimension_semantics = [#tpu.dimension_semantics<parallel>, #tpu.dimension_semantics<arbitrary>], iteration_bounds = array<i64: 2, 2>, scalar_prefetch = 0 : i64, scratch_operands = 2 : i64, tpu.core_type = #tpu.core_type<tc>, window_params = [{transform_indices = @transform_0, window_bounds = array<i64: 1, 16, 32>}, {transform_indices = @transform_1, window_bounds = array<i64: 1, 1, 16>}, {pipeline_mode = #tpu.pipeline_mode<synchronous>, transform_indices = @transform_2, window_bounds = array<i64: 32, 32>}, {pipeline_mode = #tpu.pipeline_mode<synchronous>, transform_indices = @transform_3, window_bounds = array<i64: 1, 32>}, {pipeline_mode = #tpu.pipeline_mode<synchronous>, transform_indices = @transform_4, window_bounds = array<i64: 64, 32>}, {pipeline_mode = #tpu.pipeline_mode<synchronous>, transform_indices = @transform_5, window_bounds = array<i64: 64, 1>}, {pipeline_mode = #tpu.pipeline_mode<synchronous>, transform_indices = @transform_6, window_bounds = array<i64: 32, 32>}, {pipeline_mode = #tpu.pipeline_mode<synchronous>, transform_indices = @transform_7, window_bounds = array<i64: 1, 32>}, {pipeline_mode = #tpu.pipeline_mode<synchronous>, transform_indices = @transform_8, window_bounds = array<i64: 1, 32>}, {pipeline_mode = #tpu.pipeline_mode<synchronous>, transform_indices = @transform_9, window_bounds = array<i64: 1, 32>}, {transform_indices = @transform_10, window_bounds = array<i64: 1, 8, 32>}]} {
    %c0_i32 = arith.constant 0 : i32
    %0 = arith.cmpi eq, %arg1, %c0_i32 : i32
    %1 = arith.extui %0 : i1 to i32
    %c0_i32_0 = arith.constant 0 : i32
    %2 = arith.cmpi ne, %1, %c0_i32_0 : i32
    scf.if %2 {
      %c0_37 = arith.constant 0 : index
      %c0_38 = arith.constant 0 : index
      %c0_39 = arith.constant 0 : index
      %86 = vector.load %arg2[%c0_37, %c0_38, %c0_39] : memref<1x16x32xf32, #tpu.memory_space<vmem>>, vector<1x16x32xf32>
      %87 = vector.shape_cast %86 : vector<1x16x32xf32> to vector<16x32xf32>
      %c0_40 = arith.constant 0 : index
      %c0_41 = arith.constant 0 : index
      %88 = vector.load %arg6[%c0_40, %c0_41] : memref<64x32xf32, #tpu.memory_space<vmem>>, vector<64x32xf32>
      "tpu.trace_start"() <{level = 10 : i32, message = "oi,si->os"}> : () -> ()
      %cst_42 = arith.constant dense<0.000000e+00> : vector<64x16xf32>
      %89 = tpu.matmul %88, %87, %cst_42 {dimension_numbers = #tpu.dot_dimension_numbers<[1], [1], [0], [0], [0, 0, 1, 0], [], []>} : vector<64x32xf32>, vector<16x32xf32>, vector<64x16xf32> -> vector<64x16xf32>
      "tpu.trace_stop"() : () -> ()
      %c0_43 = arith.constant 0 : index
      %c0_44 = arith.constant 0 : index
      %90 = vector.load %arg7[%c0_43, %c0_44] : memref<64x1xf32, #tpu.memory_space<vmem>>, vector<64x1xf32>
      %91 = vector.broadcast %90 : vector<64x1xf32> to vector<64x16xf32>
      %92 = arith.addf %89, %91 : vector<64x16xf32>
      %93 = vector.extract_strided_slice %92 {offsets = [0, 0], sizes = [32, 16], strides = [1, 1]} : vector<64x16xf32> to vector<32x16xf32>
      %94 = vector.shape_cast %93 : vector<32x16xf32> to vector<4x8x16xf32>
      %c0_45 = arith.constant 0 : index
      %c0_46 = arith.constant 0 : index
      %c0_47 = arith.constant 0 : index
      %95 = vector.load %arg13[%c0_45, %c0_46, %c0_47] : memref<4x8x16xf32, #tpu.memory_space<vmem>>, vector<4x8x16xf32>
      tpu.vector_store %arg13[%c0_45, %c0_46, %c0_47], %94 {strides = array<i32>} : memref<4x8x16xf32, #tpu.memory_space<vmem>>, vector<4x8x16xf32>,
      %96 = vector.extract_strided_slice %92 {offsets = [32, 0], sizes = [32, 16], strides = [1, 1]} : vector<64x16xf32> to vector<32x16xf32>
      %97 = vector.shape_cast %96 : vector<32x16xf32> to vector<4x8x16xf32>
      %c0_48 = arith.constant 0 : index
      %c0_49 = arith.constant 0 : index
      %c0_50 = arith.constant 0 : index
      %98 = vector.load %arg14[%c0_48, %c0_49, %c0_50] : memref<4x8x16xf32, #tpu.memory_space<vmem>>, vector<4x8x16xf32>
      tpu.vector_store %arg14[%c0_48, %c0_49, %c0_50], %97 {strides = array<i32>} : memref<4x8x16xf32, #tpu.memory_space<vmem>>, vector<4x8x16xf32>,
    } else {
    }
    %c8_i32 = arith.constant 8 : i32
    %3 = arith.muli %arg1, %c8_i32 : i32
    %4 = tpu.assume_multiple %3, 8 : i32
    %c0 = arith.constant 0 : index
    %5 = arith.index_cast %4 : i32 to index
    %c0_1 = arith.constant 0 : index
    %6 = vector.load %arg2[%c0, %5, %c0_1] : memref<1x16x32xf32, #tpu.memory_space<vmem>>, vector<1x8x32xf32>
    %7 = vector.shape_cast %6 : vector<1x8x32xf32> to vector<8x32xf32>
    %c0_2 = arith.constant 0 : index
    %c0_3 = arith.constant 0 : index
    %8 = vector.load %arg4[%c0_2, %c0_3] : memref<32x32xf32, #tpu.memory_space<vmem>>, vector<32x32xf32>
    %cst = arith.constant dense<0.000000e+00> : vector<8x32xf32>
    %9 = tpu.matmul %7, %8, %cst {dimension_numbers = #tpu.dot_dimension_numbers<[1], [0], [0], [1], [0, 0, 1, 1], [], []>} : vector<8x32xf32>, vector<32x32xf32>, vector<8x32xf32> -> vector<8x32xf32>
    %c0_4 = arith.constant 0 : index
    %c0_5 = arith.constant 0 : index
    %10 = vector.load %arg5[%c0_4, %c0_5] : memref<1x32xf32, #tpu.memory_space<vmem>>, vector<1x32xf32>
    %11 = vector.shape_cast %10 : vector<1x32xf32> to vector<32xf32>
    %12 = vector.shape_cast %11 : vector<32xf32> to vector<1x32xf32>
    %13 = vector.broadcast %12 : vector<1x32xf32> to vector<8x32xf32>
    %14 = arith.addf %9, %13 : vector<8x32xf32>
    %cst_6 = arith.constant 0.353553385 : f32
    %15 = vector.broadcast %cst_6 : f32 to vector<8x32xf32>
    %16 = arith.mulf %14, %15 : vector<8x32xf32>
    %17 = vector.extract_strided_slice %16 {offsets = [0, 0], sizes = [8, 8], strides = [1, 1]} : vector<8x32xf32> to vector<8x8xf32>
    %18 = vector.extract_strided_slice %16 {offsets = [0, 8], sizes = [8, 8], strides = [1, 1]} : vector<8x32xf32> to vector<8x8xf32>
    %19 = vector.extract_strided_slice %16 {offsets = [0, 16], sizes = [8, 8], strides = [1, 1]} : vector<8x32xf32> to vector<8x8xf32>
    %20 = vector.extract_strided_slice %16 {offsets = [0, 24], sizes = [8, 8], strides = [1, 1]} : vector<8x32xf32> to vector<8x8xf32>
    %21 = vector.shape_cast %17 : vector<8x8xf32> to vector<1x8x8xf32>
    %22 = vector.shape_cast %18 : vector<8x8xf32> to vector<1x8x8xf32>
    %23 = vector.shape_cast %19 : vector<8x8xf32> to vector<1x8x8xf32>
    %24 = vector.shape_cast %20 : vector<8x8xf32> to vector<1x8x8xf32>
    %25 = tpu.concatenate %21, %22, %23, %24 in 0 : vector<1x8x8xf32>, vector<1x8x8xf32>, vector<1x8x8xf32>, vector<1x8x8xf32> -> vector<4x8x8xf32>
    %c0_7 = arith.constant 0 : index
    %c0_8 = arith.constant 0 : index
    %c0_9 = arith.constant 0 : index
    %26 = vector.load %arg13[%c0_7, %c0_8, %c0_9] : memref<4x8x16xf32, #tpu.memory_space<vmem>>, vector<4x8x16xf32>
    "tpu.trace_start"() <{level = 10 : i32, message = "hqd,hds->hqs"}> : () -> ()
    %cst_10 = arith.constant dense<0.000000e+00> : vector<4x8x16xf32>
    %27 = tpu.matmul %25, %26, %cst_10 {dimension_numbers = #tpu.dot_dimension_numbers<[2], [1], [1], [2], [0, 0, 0, 1, 1, 2], [0], [0]>} : vector<4x8x8xf32>, vector<4x8x16xf32>, vector<4x8x16xf32> -> vector<4x8x16xf32>
    "tpu.trace_stop"() : () -> ()
    %c0_11 = arith.constant 0 : index
    %c0_12 = arith.constant 0 : index
    %c0_13 = arith.constant 0 : index
    %28 = vector.load %arg3[%c0_11, %c0_12, %c0_13] : memref<1x1x16xf32, #tpu.memory_space<vmem>>, vector<1x1x16xf32>
    %29 = vector.shape_cast %28 : vector<1x1x16xf32> to vector<1x16xf32>
    %30 = vector.shape_cast %29 : vector<1x16xf32> to vector<1x1x16xf32>
    %31 = vector.broadcast %30 : vector<1x1x16xf32> to vector<4x8x16xf32>
    %32 = arith.addf %27, %31 : vector<4x8x16xf32>
    %cst_14 = arith.constant dense<0xFF800000> : vector<4x8xf32>
    %33 = vector.multi_reduction <maximumf>, %32, %cst_14 [2] : vector<4x8x16xf32> to vector<4x8xf32>
    %34 = vector.shape_cast %33 : vector<4x8xf32> to vector<4x8x1xf32>
    %35 = vector.broadcast %34 : vector<4x8x1xf32> to vector<4x8x16xf32>
    %36 = arith.subf %32, %35 : vector<4x8x16xf32>
    %37 = math.exp %36 : vector<4x8x16xf32>
    %cst_15 = arith.constant dense<0.000000e+00> : vector<4x8xf32>
    %38 = vector.multi_reduction <add>, %37, %cst_15 [2] : vector<4x8x16xf32> to vector<4x8xf32>
    %39 = vector.shape_cast %38 : vector<4x8xf32> to vector<4x8x1xf32>
    %40 = tpu.reciprocal %39 : vector<4x8x1xf32> -> vector<4x8x1xf32>
    %41 = vector.broadcast %40 : vector<4x8x1xf32> to vector<4x8x16xf32>
    %42 = arith.mulf %37, %41 : vector<4x8x16xf32>
    %c0_16 = arith.constant 0 : index
    %c0_17 = arith.constant 0 : index
    %c0_18 = arith.constant 0 : index
    %43 = vector.load %arg14[%c0_16, %c0_17, %c0_18] : memref<4x8x16xf32, #tpu.memory_space<vmem>>, vector<4x8x16xf32>
    "tpu.trace_start"() <{level = 10 : i32, message = "hds,hqs->hdq"}> : () -> ()
    %cst_19 = arith.constant dense<0.000000e+00> : vector<4x8x8xf32>
    %44 = tpu.matmul %43, %42, %cst_19 {dimension_numbers = #tpu.dot_dimension_numbers<[2], [2], [1], [1], [0, 0, 0, 1, 1, 1], [0], [0]>} : vector<4x8x16xf32>, vector<4x8x16xf32>, vector<4x8x8xf32> -> vector<4x8x8xf32>
    "tpu.trace_stop"() : () -> ()
    %45 = vector.shape_cast %44 : vector<4x8x8xf32> to vector<32x8xf32>
    %46 = tpu.transpose %45, [1, 0] : vector<32x8xf32> -> vector<8x32xf32>
    %c0_20 = arith.constant 0 : index
    %c0_21 = arith.constant 0 : index
    %47 = vector.load %arg8[%c0_20, %c0_21] : memref<32x32xf32, #tpu.memory_space<vmem>>, vector<32x32xf32>
    %cst_22 = arith.constant dense<0.000000e+00> : vector<8x32xf32>
    %48 = tpu.matmul %46, %47, %cst_22 {dimension_numbers = #tpu.dot_dimension_numbers<[1], [0], [0], [1], [0, 0, 1, 1], [], []>} : vector<8x32xf32>, vector<32x32xf32>, vector<8x32xf32> -> vector<8x32xf32>
    %c0_23 = arith.constant 0 : index
    %c0_24 = arith.constant 0 : index
    %49 = vector.load %arg9[%c0_23, %c0_24] : memref<1x32xf32, #tpu.memory_space<vmem>>, vector<1x32xf32>
    %50 = vector.shape_cast %49 : vector<1x32xf32> to vector<32xf32>
    %51 = vector.shape_cast %50 : vector<32xf32> to vector<1x32xf32>
    %52 = vector.broadcast %51 : vector<1x32xf32> to vector<8x32xf32>
    %53 = arith.addf %48, %52 : vector<8x32xf32>
    %54 = arith.addf %53, %7 : vector<8x32xf32>
    %cst_25 = arith.constant dense<0.000000e+00> : vector<8xf32>
    %55 = vector.multi_reduction <add>, %54, %cst_25 [1] : vector<8x32xf32> to vector<8xf32>
    %56 = vector.shape_cast %55 : vector<8xf32> to vector<8x1xf32>
    %cst_26 = arith.constant 3.200000e+01 : f32
    %57 = vector.broadcast %cst_26 : f32 to vector<8x1xf32>
    %58 = arith.divf %56, %57 : vector<8x1xf32>
    %59 = vector.broadcast %58 : vector<8x1xf32> to vector<8x32xf32>
    %60 = arith.subf %54, %59 : vector<8x32xf32>
    %61 = arith.mulf %60, %60 : vector<8x32xf32>
    %cst_27 = arith.constant dense<0.000000e+00> : vector<8xf32>
    %62 = vector.multi_reduction <add>, %61, %cst_27 [1] : vector<8x32xf32> to vector<8xf32>
    %63 = vector.shape_cast %62 : vector<8xf32> to vector<8x1xf32>
    %cst_28 = arith.constant 3.200000e+01 : f32
    %64 = vector.broadcast %cst_28 : f32 to vector<8x1xf32>
    %65 = arith.divf %63, %64 : vector<8x1xf32>
    %66 = vector.broadcast %58 : vector<8x1xf32> to vector<8x32xf32>
    %67 = arith.subf %54, %66 : vector<8x32xf32>
    %cst_29 = arith.constant 9.99999996E-13 : f32
    %68 = vector.broadcast %cst_29 : f32 to vector<8x1xf32>
    %69 = arith.addf %65, %68 : vector<8x1xf32>
    %70 = math.rsqrt %69 : vector<8x1xf32>
    %71 = vector.broadcast %70 : vector<8x1xf32> to vector<8x32xf32>
    %72 = arith.mulf %67, %71 : vector<8x32xf32>
    %c0_30 = arith.constant 0 : index
    %c0_31 = arith.constant 0 : index
    %73 = vector.load %arg10[%c0_30, %c0_31] : memref<1x32xf32, #tpu.memory_space<vmem>>, vector<1x32xf32>
    %74 = vector.shape_cast %73 : vector<1x32xf32> to vector<32xf32>
    %75 = vector.shape_cast %74 : vector<32xf32> to vector<1x32xf32>
    %76 = vector.broadcast %75 : vector<1x32xf32> to vector<8x32xf32>
    %77 = arith.mulf %72, %76 : vector<8x32xf32>
    %c0_32 = arith.constant 0 : index
    %c0_33 = arith.constant 0 : index
    %78 = vector.load %arg11[%c0_32, %c0_33] : memref<1x32xf32, #tpu.memory_space<vmem>>, vector<1x32xf32>
    %79 = vector.shape_cast %78 : vector<1x32xf32> to vector<32xf32>
    %80 = vector.shape_cast %79 : vector<32xf32> to vector<1x32xf32>
    %81 = vector.broadcast %80 : vector<1x32xf32> to vector<8x32xf32>
    %82 = arith.addf %77, %81 : vector<8x32xf32>
    %c0_34 = arith.constant 0 : index
    %c0_35 = arith.constant 0 : index
    %c0_36 = arith.constant 0 : index
    %83 = vector.load %arg12[%c0_34, %c0_35, %c0_36] : memref<1x8x32xf32, #tpu.memory_space<vmem>>, vector<1x8x32xf32>
    %84 = vector.shape_cast %83 : vector<1x8x32xf32> to vector<8x32xf32>
    %85 = vector.shape_cast %82 : vector<8x32xf32> to vector<1x8x32xf32>
    tpu.vector_store %arg12[%c0_34, %c0_35, %c0_36], %85 {strides = array<i32>} : memref<1x8x32xf32, #tpu.memory_space<vmem>>, vector<1x8x32xf32>,
    return
  }
  func.func @transform_0(%arg0: i32, %arg1: i32) -> (i32, i32, i32) {
    %c0_i32 = arith.constant 0 : i32
    %c0_i32_0 = arith.constant 0 : i32
    %c0_i32_1 = arith.constant 0 : i32
    return %arg0, %c0_i32, %c0_i32_0 : i32, i32, i32
  }
  func.func @transform_1(%arg0: i32, %arg1: i32) -> (i32, i32, i32) {
    %c0_i32 = arith.constant 0 : i32
    %c0_i32_0 = arith.constant 0 : i32
    %c0_i32_1 = arith.constant 0 : i32
    return %arg0, %c0_i32, %c0_i32_0 : i32, i32, i32
  }
  func.func @transform_2(%arg0: i32, %arg1: i32) -> (i32, i32) {
    %c0_i32 = arith.constant 0 : i32
    %c0_i32_0 = arith.constant 0 : i32
    %c0_i32_1 = arith.constant 0 : i32
    return %c0_i32, %c0_i32_0 : i32, i32
  }
  func.func @transform_3(%arg0: i32, %arg1: i32) -> (i32, i32) {
    %c0_i32 = arith.constant 0 : i32
    %c0_i32_0 = arith.constant 0 : i32
    %c0_i32_1 = arith.constant 0 : i32
    return %c0_i32, %c0_i32_0 : i32, i32
  }
  func.func @transform_4(%arg0: i32, %arg1: i32) -> (i32, i32) {
    %c0_i32 = arith.constant 0 : i32
    %c0_i32_0 = arith.constant 0 : i32
    %c0_i32_1 = arith.constant 0 : i32
    return %c0_i32, %c0_i32_0 : i32, i32
  }
  func.func @transform_5(%arg0: i32, %arg1: i32) -> (i32, i32) {
    %c0_i32 = arith.constant 0 : i32
    %c0_i32_0 = arith.constant 0 : i32
    %c0_i32_1 = arith.constant 0 : i32
    return %c0_i32, %c0_i32_0 : i32, i32
  }
  func.func @transform_6(%arg0: i32, %arg1: i32) -> (i32, i32) {
    %c0_i32 = arith.constant 0 : i32
    %c0_i32_0 = arith.constant 0 : i32
    %c0_i32_1 = arith.constant 0 : i32
    return %c0_i32, %c0_i32_0 : i32, i32
  }
  func.func @transform_7(%arg0: i32, %arg1: i32) -> (i32, i32) {
    %c0_i32 = arith.constant 0 : i32
    %c0_i32_0 = arith.constant 0 : i32
    %c0_i32_1 = arith.constant 0 : i32
    return %c0_i32, %c0_i32_0 : i32, i32
  }
  func.func @transform_8(%arg0: i32, %arg1: i32) -> (i32, i32) {
    %c0_i32 = arith.constant 0 : i32
    %c0_i32_0 = arith.constant 0 : i32
    %c0_i32_1 = arith.constant 0 : i32
    return %c0_i32, %c0_i32_0 : i32, i32
  }
  func.func @transform_9(%arg0: i32, %arg1: i32) -> (i32, i32) {
    %c0_i32 = arith.constant 0 : i32
    %c0_i32_0 = arith.constant 0 : i32
    %c0_i32_1 = arith.constant 0 : i32
    return %c0_i32, %c0_i32_0 : i32, i32
  }
  func.func @transform_10(%arg0: i32, %arg1: i32) -> (i32, i32, i32) {
    %c0_i32 = arith.constant 0 : i32
    %c0_i32_0 = arith.constant 0 : i32
    return %arg0, %arg1, %c0_i32 : i32, i32, i32
  }
}

</mosaic_0001>

<bundles_post_ra>
// kernel: tpu_custom_call.1
= control target key start
LH: loop header
LB: loop body
LE: loop exit
PB: predicated region body
PF: predicated region fallthrough
CT: control target
= control target key end

     0   :  { %s2353_s0 = inlined_call_operand.vmem [shape: f32[2,16,32], index: 0, kind: input, shape index: {}]   ;;  %s2354_s1 = inlined_call_operand.vmem [shape: f32[2,1,16], index: 1, kind: input, shape index: {}]   ;;  %s2355_s2 = inlined_call_operand.vmem [shape: f32[32,32], index: 2, kind: input, shape index: {}]   ;;  %s2356_s3 = inlined_call_operand.vmem [shape: f32[1,32], index: 3, kind: input, shape index: {}]   ;;  %s2357_s4 = inlined_call_operand.vmem [shape: f32[64,32], index: 4, kind: input, shape index: {}]   ;;  %s2358_s5 = inlined_call_operand.vmem [shape: f32[64,1], index: 5, kind: input, shape index: {}]   ;;  %s2359_s6 = inlined_call_operand.vmem [shape: f32[32,32], index: 6, kind: input, shape index: {}]   ;;  %s2360_s7 = inlined_call_operand.vmem [shape: f32[1,32], index: 7, kind: input, shape index: {}]   ;;  %s2361_s8 = inlined_call_operand.vmem [shape: f32[1,32], index: 8, kind: input, shape index: {}]   ;;  %s2362_s9 = inlined_call_operand.vmem [shape: f32[1,32], index: 9, kind: input, shape index: {}]   ;;  %s2363_s10 = inlined_call_operand.hbm [shape: f32[2,16,32], index: 10, kind: output, shape index: {}]  }
   0x1   :  { %2371 = sst [smem:[#allocation14_spill]] %s2353_s0 }
   0x2   :  { %15 = vsyncpa [#allocation5], 0 }
   0x3   :  { %17 = vsyncpa [#allocation5 + $0x1], 0  ;;  %s2025_s13 = smov 0   ;;  %s2027_s14 = smov 0  }
   0x4   :  { %s2029_s15 = smov 0   ;;  %s2031_s16 = smov 0  }
   0x5   :  { %s2033_s17 = smov 0   ;;  %s2035_s18 = smov 0  }
   0x6   :  { %s2037_s19 = smov 0   ;;  %s2039_s20 = smov 0  }
   0x7 LB: > { %2372 = sst [smem:[#allocation7_spill]] %s1940_s15  ;;  %s1589_s21 = sadd.s32 4294967295, %s1960_s20   ;;  %s1960_s20 = sphi %s2039_s20, %s23_s20   ;;  %s1956_s19 = sphi %s2037_s19, %s2392_s19   ;;  %s1952_s18 = sphi %s2035_s18, %s2391_s18   ;;  %s1948_s17 = sphi %s2033_s17, %s2390_s17   ;;  %s1944_s16 = sphi %s2031_s16, %s2389_s16   ;;  %s1940_s15 = sphi %s2029_s15, %s2388_s15   ;;  %s1936_s14 = sphi %s2027_s14, %s2394_s14   ;;  %s1932_s13 = sphi %s2025_s13, %s2393_s13  }
   0x8   : > { %2373 = sst [smem:[#allocation8_spill]] %s1952_s18  ;;  %s1590_s22 = sadd.s32 4294967294, %s1960_s20  }
   0x9   : > { %2374 = sst [smem:[#allocation9_spill]] %s1956_s19  ;;  %s32_s23 = sadd.s32 1, %s1952_s18 }
   0xa   : > { %p33_p0 = scmp.ge.s32.totalorder %s32_s23, 2  ;;  %s35_s24 = sadd.s32 1, %s1956_s19 }
   0xb   : > { %p274_p1 = scmp.ne.s32.totalorder %s1940_s15, %s1936_s14  ;;  %p275_p2 = scmp.eq.s32.totalorder %s1589_s21, 3 }
   0xc   : > { %s2396_s23 = smov (%p33_p0, %s32_s23), 0  ;;  %s2398_s24 = smov (!%p33_p0, %s35_s24), %s1956_s19 }
   0xd   : > { %2375 = sst [smem:[#allocation10_spill]] %s2396_s23  ;;  %s260_s25 = ssub.s32 %s1952_s18, %s2396_s23 }
   0xe   : > { %p2076_p3 = por %p275_p2, %p274_p1  ;;  %p37_p4 = scmp.ge.s32.totalorder %s2398_s24, 2 }
   0xf   : > { %p280_p5 = scmp.ne.s32.totalorder %s1936_s14, %s1932_s13  ;;  %p281_p6 = scmp.eq.s32.totalorder %s1590_s22, 3 }
  0x10   : > { %p1593_p7 = scmp.ge.s32.totalorder %s1960_s20, 1  ;;  %s2400_s24 = smov (%p37_p4, %s2398_s24), 0 }
  0x11   : > { %2377 = sst [smem:[#allocation11_spill]] %s2400_s24  ;;  %p2085_p8 = por %p281_p6, %p280_p5 }
  0x12   : > { %p337_p9 = scmp.lt.s32.totalorder %s1960_s20, 5  ;;  %s259_s28 = ssub.s32 %s1956_s19, %s2400_s24 }
  0x13   : > { %s2378_s27 = scalar_select %p2085_p8, 1, 0 }
  0x14   : > { %s264_s29 = sadd.s32 1, %s1940_s15  ;;  %s261_s30 = sor.u32 %s260_s25, %s259_s28 }
  0x15   : > { %2379 = sst [smem:[#allocation12_spill]] %s2378_s27  ;;  %p338_p10 = pnand %p1593_p7, %p337_p9 }
  0x16   : > { %p262_p11 = scmp.eq.s32.totalorder %s261_s30, 0  ;;  %s2368_s12 = sand.u32 (!%p338_p10), 1, %s1936_s14  }
  0x17   : > { %341 = sbr.rel (%p338_p10) target bundleno = 2017 (0x7e1), region = 60  ;;  %p378_p12 = scmp.lt.s32.totalorder (!%p338_p10), %s1948_s17, 1 }
  0x18   : > { %s2094_s11 = scalar_select %p262_p11, %s1940_s15, %s264_s29  }
  0x19   : > { %s2100_s21 = sshll.u32 (!%p338_p10), %s2368_s12, 3  ;;  %s2381_s0 = sld [smem:[#allocation14_spill]] (!%p338_p10) }
  0x1a   : > { %2380 = sst [smem:[#allocation13_spill]] %s2094_s11  ;;  %p1597_p13 = scmp.ne.s32.totalorder (!%p338_p10), %s1944_s16, 0 }
  0x1e   : > { %s2103_s22 = scalar_select %p378_p12, %s1948_s17, 1 }
  0x1f   : > { %389 = sbr.rel (%p1597_p13) target bundleno = 265 (0x109), region = 64  ;;  %vm448_vm0 = vcmask (!%p1597_p13), 261120   ;;  %v392_v2 = vld [vmem:[%s2357_s4] sm:$0xff] (!%p1597_p13)  ;;  %v1962_v5 = vmov (!%p1597_p13), 0   ;;  %v402_v6 = vld [vmem:[%s2358_s5 + $0x10] sm:$0xff] (!%p1597_p13)  ;;  %v403_v8 = vld [vmem:[%s2358_s5 + $0x18] sm:$0xff] (!%p1597_p13) }
  0x20   : > { %s1633_s25 = sshll.u32 %s2103_s22, 4  ;;  %vm1749_vm1 = vmpackc.low (!%p1597_p13), %vm448_vm0, %vm448_vm0  ;;  %1674 = vmatprep.mubr.msk.f32.mxu0 (!%p1597_p13), %vm448_vm0, %v392_v2  ;;  %v396_v4 = vld [vmem:[%s2357_s4 + $0x20] sm:$0xff] (!%p1597_p13)  ;;  %1847 = vset.pattern.permute.xlu1 (!%p1597_p13), %v1962_v5  ;;  %v401_v9 = vld [vmem:[%s2358_s5 + $0x8] sm:$0xff] (!%p1597_p13)  ;;  %vm584_vm2 = vcmask (!%p1597_p13), 130048  }
  0x21   : > { %s2113_s19 = scalar_lea.vmem %s2381_s0, %s1633_s25  ;;  %1680 = vmatprep.mubr.msk.f32.mxu1 (!%p1597_p13), %vm448_vm0, %v396_v4  ;;  %1846 = vset.pattern.permute.xlu0 (!%p1597_p13), %v1962_v5  ;;  %v400_v7 = vld [vmem:[%s2358_s5] sm:$0xff] (!%p1597_p13)  ;;  %v393_v10 = vld [vmem:[%s2357_s4 + $0x8] sm:$0xff] (!%p1597_p13)  ;;  %v394_v12 = vld [vmem:[%s2357_s4 + $0x10] sm:$0xff] (!%p1597_p13) }
  0x22   : > { %v390_v0 = vld [vmem:[%s2113_s19] sm:$0xff] (!%p1597_p13)  ;;  %v391_v1 = vld [vmem:[%s2113_s19 + $0x8] sm:$0xff] (!%p1597_p13)  ;;  %420 = vperm.xlu1 (!%p1597_p13), %1847, %v402_v6   ;;  %410 = vperm.xlu0 (!%p1597_p13), %1846, %v400_v7   ;;  %v398_v13 = vld [vmem:[%s2357_s4 + $0x30] sm:$0xff] (!%p1597_p13) }
  0x23   : > { %v1748_v3 = vpack.c.bf16 (!%p1597_p13), %v391_v1, %v390_v0  ;;  %v397_v11 = vld [vmem:[%s2357_s4 + $0x28] sm:$0xff] (!%p1597_p13)  ;;  %v404_v15 = vld [vmem:[%s2358_s5 + $0x20] sm:$0xff] (!%p1597_p13)  ;;  %v395_v16 = vld [vmem:[%s2357_s4 + $0x18] sm:$0xff] (!%p1597_p13) }
  0x24   : > { %v405_v14 = vld [vmem:[%s2358_s5 + $0x28] sm:$0xff] (!%p1597_p13)  ;;  %v399_v17 = vld [vmem:[%s2357_s4 + $0x38] sm:$0xff] (!%p1597_p13)  ;;  %v406_v19 = vld [vmem:[%s2358_s5 + $0x30] sm:$0xff] (!%p1597_p13) }
  0x25   : > { %1750 = vmatprep.subr.msk.bf16.mxu0 (!%p1597_p13), %vm1749_vm1, %v1748_v3  ;;  %1766 = vmatprep.subr.msk.bf16.mxu1 (!%p1597_p13), %vm1749_vm1, %v1748_v3  ;;  %v407_v18 = vld [vmem:[%s2358_s5 + $0x38] sm:$0xff] (!%p1597_p13) }
  0x26   : > { %1753 = vmatpush3.bf16.xpose.msk.msra.mxu0 %vm1749_vm1, %v1748_v3  ;;  %1767 = vmatpush3.bf16.xpose.msk.msra.mxu1 %vm1749_vm1, %v1748_v3 }
  0x27   : > { %425 = vperm.xlu1 %1847, %v403_v8   ;;  %415 = vperm.xlu0 %1846, %v401_v9  }
  0x2b   : > { %435 = vperm.xlu1 %1847, %v405_v14   ;;  %430 = vperm.xlu0 %1846, %v404_v15  }
  0x2d   : > { %1675 = vmatmul.mubr.msk.f32.vlgmr.msra.gmra.mrb[0].mxu0 %vm448_vm0, %v393_v10  ;;  %1681 = vmatmul.mubr.msk.f32.vlgmr.msra.gmra.mrb[0].mxu1 %vm448_vm0, %v397_v11 }
  0x2e   : > { %1677 = vmatprep.mubr.msk.f32.mxu0 %vm448_vm0, %v394_v12  ;;  %1683 = vmatprep.mubr.msk.f32.mxu1 %vm448_vm0, %v398_v13 }
  0x2f   : > { %445 = vperm.xlu1 %1847, %v407_v18   ;;  %440 = vperm.xlu0 %1846, %v406_v19  }
  0x31   : > { %1678 = vmatmul.mubr.msk.f32.gmra.mrb[2].mxu0 %vm448_vm0, %v395_v16  ;;  %1684 = vmatmul.mubr.msk.f32.gmra.mrb[2].mxu1 %vm448_vm0, %v399_v17 }
  0xa1   : > { %v421_v20 = vpop.permute.xlu1 %420  ;;  %v411_v21 = vpop.permute.xlu0 %410 }
  0xa6   : > { %v426_v22 = vpop.permute.xlu1 %425  ;;  %v416_v23 = vpop.permute.xlu0 %415 }
  0xaa   : > { %v436_v24 = vpop.permute.xlu1 %435  ;;  %v431_v25 = vpop.permute.xlu0 %430 }
  0xae   : > { %v446_v34 = vpop.permute.xlu1 %445  ;;  %v441_v35 = vpop.permute.xlu0 %440 }
 0x100   : > { %v1676_v26 = vpop.f32.mrb[0].mxu0  ;;  %v1682_v27 = vpop.f32.mrb[0].mxu1 }
 0x101   : > { %v551_v28 = vadd.f32 %v1676_v26, %v416_v23  ;;  %v571_v29 = vadd.f32 %v1682_v27, %v436_v24  ;;  %v545_v30 = vpop.f32.mrb[1].mxu0  ;;  %v565_v31 = vpop.f32.mrb[1].mxu1 }
 0x102   : > { %v546_v32 = vadd.f32 %v545_v30, %v411_v21  ;;  %v566_v33 = vadd.f32 %v565_v31, %v431_v25 }
 0x103   : > { %586 = vst.msk [vmem:[#allocation2 + $0x8] sm:$0xff] %vm584_vm2, %v551_v28  ;;  %590 = vst.msk [vmem:[#allocation3 + $0x8] sm:$0xff] %vm584_vm2, %v571_v29 }
 0x104   : > { %585 = vst.msk [vmem:[#allocation2] sm:$0xff] %vm584_vm2, %v546_v32  ;;  %589 = vst.msk [vmem:[#allocation3] sm:$0xff] %vm584_vm2, %v566_v33  ;;  %v1679_v36 = vpop.f32.mrb[2].mxu0  ;;  %v1685_v37 = vpop.f32.mrb[2].mxu1 }
 0x105   : > { %v561_v38 = vadd.f32 %v1679_v36, %v426_v22  ;;  %v581_v39 = vadd.f32 %v1685_v37, %v446_v34  ;;  %v555_v40 = vpop.f32.mrb[3].mxu0  ;;  %v575_v41 = vpop.f32.mrb[3].mxu1 }
 0x106   : > { %v556_v42 = vadd.f32 %v555_v40, %v421_v20  ;;  %v576_v43 = vadd.f32 %v575_v41, %v441_v35 }
 0x107   : > { %588 = vst.msk [vmem:[#allocation2 + $0x18] sm:$0xff] %vm584_vm2, %v561_v38  ;;  %592 = vst.msk [vmem:[#allocation3 + $0x18] sm:$0xff] %vm584_vm2, %v581_v39 }
 0x108   : > { %587 = vst.msk [vmem:[#allocation2 + $0x10] sm:$0xff] %vm584_vm2, %v556_v42  ;;  %591 = vst.msk [vmem:[#allocation3 + $0x10] sm:$0xff] %vm584_vm2, %v576_v43 }
 0x109 PF: > { %v596_v44 = vld [vmem:[%s2355_s2] sm:$0xff]  ;;  %v597_v45 = vld [vmem:[%s2355_s2 + $0x8] sm:$0xff]  ;;  %v598_v46 = vld [vmem:[%s2355_s2 + $0x10] sm:$0xff]  ;;  %v1963_v47 = vmov 0.0|0.0   ;;  %vm1964_vm3 = vmmov 0   ;;  %v1965_v50 = vmov 0.0   ;;  %s2382_s15 = scalar_lea.vmem %s2354_s1, %s2103_s22 }
 0x10a   : > { %1754 = vmatprep.subr.bf16.mxu0 %v1963_v47  ;;  %v1755_v48 = vpack.c.bf16 %v597_v45, %v596_v44  ;;  %v599_v49 = vld [vmem:[%s2355_s2 + $0x18] sm:$0xff]  ;;  %1694 = vmatprep.mubr.msk.f32.mxu0 %vm1964_vm3, %v1965_v50  ;;  %s1608_s25 = sshll.u32 %s1944_s16, 3  ;;  %vm607_vm4 = vcmask 261120   ;;  %v690_v54 = vld [vmem:[#allocation2 + $0x8] sm:$0xff]  ;;  %v1609_v55 = vld [vmem:[%s2356_s3] ss:$0 sm:$0xff] }
 0x10b   : > { %1702 = vmatprep.subr.mxu1 %v1965_v50  ;;  %1704 = vmatprep.mubr.msk.f32.mxu1 %vm1964_vm3, %v1965_v50  ;;  %v1758_v51 = vpack.c.bf16 %v599_v49, %v598_v46  ;;  %s594_s11 = scalar_lea.vmem %s2113_s19, %s1608_s25  ;;  %v689_v53 = vld [vmem:[#allocation2] sm:$0xff]  ;;  %vm700_vm5 = vcmask 64512   ;;  %s1966_s28 = smov 104   ;;  %vm989_vm6 = vcmask 130048  }
 0x10c   : > { %1756 = vmatpush3.bf16.msra.mxu0 %v1755_v48  ;;  %v2206_v52 = vld [vmem:[%s594_s11] sm:$0xff]  ;;  %1703 = vmatpush3.msra.mxu1 %v690_v54  ;;  %s1967_s18 = smov 120   ;;  %s1968_s30 = smov 112   ;;  %v1035_v48 = vld [vmem:[#allocation3 + $0x8] sm:$0xff] }
 0x10d   : > { %1757 = vmatprep.subr.bf16.mxu0 %v1963_v47  ;;  %1707 = vmatprep.subr.mxu1 %v1965_v50  ;;  %v1611_v1 = vld [vmem:[%s2382_s15] ss:$0 sm:$0xff]  ;;  %s2383_s24 = scalar_lea.vmem [#allocation4], %s2100_s21  ;;  %s2385_s12 = sand.u32 1, %s1936_s14  }
 0x10e   : > { %v692_v60 = vld [vmem:[#allocation2 + $0x18] sm:$0xff]  ;;  %v1034_v41 = vld [vmem:[#allocation3] sm:$0xff]  ;;  %s1506_s25 = sshll.u32 %s2383_s24, 4  ;;  %s2297_s25 = int_to_ptr.vmem [resolvable:$true] %s1506_s25 }
 0x10f   : > { %v691_v61 = vld [vmem:[#allocation2 + $0x10] sm:$0xff] }
 0x110   : > { %1759 = vmatpush3.bf16.msra.mxu0 %v1758_v51 }
 0x111   : > { %1697 = vmatprep.subr.mxu0 %v1965_v50 }
 0x113   : > { %1695 = vmatmul.mubr.msk.f32.vlgmr.msra.gmra.mrb[0].mxu0 %vm607_vm4, %v2206_v52 }
 0x114   : > { %1699 = vmatprep.mubr.msk.f32.mxu0 %vm1964_vm3, %v1965_v50  ;;  %1698 = vmatpush3.msra.mxu0 %v689_v53 }
 0x115   : > { %1712 = vmatprep.subr.mxu0 %v1965_v50 }
 0x1e6   : > { %v677_v56 = vpop.f32.mrb[0].mxu0 }
 0x1e7   : > { %v678_v57 = vadd.f32 %v1609_v55, %v677_v56  ;;  %v1696_v58 = vpop.f32.mrb[1].mxu0  ;;  %v1036_v55 = vld [vmem:[#allocation3 + $0x10] sm:$0xff]  ;;  %v1037_v56 = vld [vmem:[#allocation3 + $0x18] sm:$0xff] }
 0x1e8   : > { %v1375_v58 = vld [vmem:[%s2359_s6 + $0x8] sm:$0xff] }
 0x1e9   : > { %v681_v59 = vmul.f32 0.35355338, %v678_v57  ;;  %v1374_v57 = vld [vmem:[%s2359_s6] sm:$0xff] }
 0x1eb   : > { %687 = vrot.lane.b32.xlu1 %v681_v59, %s1966_s28  ;;  %683 = vrot.lane.b32.xlu0 %v681_v59, %s1967_s18  ;;  %s1491_s28 = scalar_lea.sflag [#allocation5], %s2385_s12  ;;  %s1866_s18 = scalar_lea.vmem %s2297_s25, 128 }
 0x1ec   : > { %1700 = vmatmul.mubr.msk.f32.vlgmr.msra.gmra.mrb[2].mxu0 %vm700_vm5, %v681_v59  ;;  %p1867_p0 = scmp.ne.s32.totalorder %s2297_s25, %s1866_s18 }
 0x1ed   : > { %1713 = vmatpush3.msra.mxu0 %v692_v60  ;;  %1714 = vmatprep.mubr.msk.f32.mxu0 %vm1964_vm3, %v1965_v50  ;;  %v1761_v60 = vpack.c.bf16 %v1375_v58, %v1374_v57 }
 0x1ee   : > { %1722 = vmatprep.subr.mxu0 %v1965_v50  ;;  %p1868_p1 = pnand %p1867_p0, %p2076_p3 }
 0x1ef   : > { %685 = vrot.lane.b32.xlu0 %v681_v59, %s1968_s30  ;;  %v1376_v59 = vld [vmem:[%s2359_s6 + $0x10] sm:$0xff]  ;;  %s1629_s30 = sshll.u32 %s1948_s17, 1 }
 0x1f0   : > { %s1502_s0 = sadd.s32 %s1944_s16, %s1629_s30  ;;  %s2384_s16 = smov %s2383_s24 }
 0x1f1   : > { %s1630_s23 = sshll.u32 %s1502_s0, 7  ;;  %p1869_p2 = pneg %p1868_p1 }
 0x1f2   : > { %s2295_s17 = scalar_lea.hbm %s2363_s10, %s1630_s23  ;;  %s1969_s30 = smov [#allocation4]  }
 0x1f3   : > { %s1870_s0 = sshll.u32 %s1969_s30, 4  ;;  %s1871_s0 = int_to_ptr.vmem [resolvable:$false] %s1870_s0 }
 0x1f4   : > { %s1872_s29 = scalar_lea.vmem %s1871_s0, 256  ;;  %p1873_p4 = scmp.lt.s32.totalorder %s2297_s25, %s1871_s0 }
 0x1f5   : > { %p1874_p5 = scmp.lt.s32.totalorder %s1872_s29, %s1866_s18 }
 0x1f7   : > { %p1875_p6 = por %p1874_p5, %p1873_p4 }
 0x1f9   : > { %p1876_p7 = pnand %p1875_p6, %p1869_p2 }
 0x25d   : > { %v688_v62 = vpop.permute.xlu1 %687  ;;  %v684_v63 = vpop.permute.xlu0 %683 }
 0x25e   : > { %1705 = vmatmul.mubr.msk.f32.vlgmr.msra.gmra.mrb[0].mxu1 %vm700_vm5, %v684_v63  ;;  %1715 = vmatmul.mubr.msk.f32.vlgmr.msra.gmra.mrb[4].mxu0 %vm700_vm5, %v688_v62 }
 0x25f   : > { %1708 = vmatpush3.msra.mxu1 %v691_v61  ;;  %1709 = vmatprep.mubr.msk.f32.mxu1 %vm1964_vm3, %v1965_v50  ;;  %v1377_v61 = vld [vmem:[%s2359_s6 + $0x18] sm:$0xff] }
 0x260   : > { %1717 = vmatprep.subr.mxu1 %v1965_v50  ;;  %1724 = vmatprep.mubr.msk.f32.mxu0 %vm1964_vm3, %v1965_v50  ;;  %v1764_v62 = vpack.c.bf16 %v1377_v61, %v1376_v59 }
 0x261   : > { %v686_v0 = vpop.permute.xlu0 %685 }
 0x262   : > { %1710 = vmatmul.mubr.msk.f32.vlgmr.msra.gmra.mrb[2].mxu1 %vm700_vm5, %v686_v0 }
 0x263   : > { %1719 = vmatprep.mubr.msk.f32.mxu1 %vm1964_vm3, %v1965_v50 }
 0x2bf   : > { %v769_v2 = vpop.f32.mrb[2].mxu0 }
 0x2c0   : > { %v770_v3 = vadd.f32 %v1611_v1, %v769_v2  ;;  %v1701_v4 = vpop.f32.mrb[3].mxu0 }
 0x2c2   : > { %v990_v5 = vsel %vm989_vm6, %v770_v3, -inf }
 0x2c3   : > { %991 = vmax.xlane.f32.xlu1 %v990_v5 }
 0x331   : > { %v841_v6 = vpop.f32.mrb[0].mxu1  ;;  %v985_v7 = vpop.f32.mrb[4].mxu0 }
 0x332   : > { %v842_v8 = vadd.f32 %v1611_v1, %v841_v6  ;;  %v986_v9 = vadd.f32 %v1611_v1, %v985_v7  ;;  %v1706_v10 = vpop.f32.mrb[1].mxu1  ;;  %v1716_v11 = vpop.f32.mrb[5].mxu0 }
 0x334   : > { %v993_v12 = vsel %vm989_vm6, %v842_v8, -inf  ;;  %v999_v13 = vsel %vm989_vm6, %v986_v9, -inf }
 0x335   : > { %994 = vmax.xlane.f32.xlu0 %v993_v12  ;;  %v913_v14 = vpop.f32.mrb[2].mxu1  ;;  %1000 = vmax.xlane.f32.xlu1 %v999_v13 }
 0x336   : > { %v914_v15 = vadd.f32 %v1611_v1, %v913_v14  ;;  %v1711_v16 = vpop.f32.mrb[3].mxu1 }
 0x338   : > { %v996_v17 = vsel %vm989_vm6, %v914_v15, -inf }
 0x339   : > { %997 = vmax.xlane.f32.xlu0 %v996_v17 }
 0x350   : > { %v992_v18 = vpop.xlane.xlu1 %991 }
 0x351   : > { %v1002_v19 = vsub.f32 %v770_v3, %v992_v18 }
 0x353   : > { %v1006_v20 = vmul.f32 1.442695, %v1002_v19 }
 0x355   : > { %1848 = vpow2.f32 %v1006_v20  ;;  %v1626_v20 = vld [vmem:[%s2361_s8] ss:$0 sm:$0xff] }
 0x35f   : > { %v1849_v21 = vpop.eup %1848 }
 0x360   : > { %v1014_v22 = vsel %vm989_vm6, %v1849_v21, 0.0 }
 0x361   : > { %1015 = vadd.xlane.f32.xlu0 %v1014_v22  ;;  %v1627_v22 = vld [vmem:[%s2362_s9] ss:$0 sm:$0xff] }
 0x3c2   : > { %v995_v23 = vpop.xlane.xlu0 %994  ;;  %v1001_v24 = vpop.xlane.xlu1 %1000 }
 0x3c3   : > { %v1003_v25 = vsub.f32 %v842_v8, %v995_v23  ;;  %v1005_v26 = vsub.f32 %v986_v9, %v1001_v24 }
 0x3c5   : > { %v1008_v27 = vmul.f32 1.442695, %v1003_v25  ;;  %v1012_v28 = vmul.f32 1.442695, %v1005_v26 }
 0x3c6   : > { %v998_v29 = vpop.xlane.xlu0 %997 }
 0x3c7   : > { %1850 = vpow2.f32 %v1008_v27  ;;  %v1004_v30 = vsub.f32 %v914_v15, %v998_v29 }
 0x3c8   : > { %1852 = vpow2.f32 %v1012_v28 }
 0x3c9   : > { %v1010_v31 = vmul.f32 1.442695, %v1004_v30 }
 0x3cb   : > { %1854 = vpow2.f32 %v1010_v31 }
 0x3d1   : > { %v1851_v32 = vpop.eup %1850 }
 0x3d2   : > { %v1017_v33 = vsel %vm989_vm6, %v1851_v32, 0.0  ;;  %v1853_v34 = vpop.eup %1852 }
 0x3d3   : > { %1018 = vadd.xlane.f32.xlu1 %v1017_v33  ;;  %v1023_v37 = vsel %vm989_vm6, %v1853_v34, 0.0 }
 0x3d5   : > { %v1855_v35 = vpop.eup %1854 }
 0x3d6   : > { %v1020_v36 = vsel %vm989_vm6, %v1855_v35, 0.0 }
 0x3d7   : > { %1021 = vadd.xlane.f32.xlu0 %v1020_v36  ;;  %1024 = vadd.xlane.f32.xlu1 %v1023_v37 }
 0x3ee   : > { %v1016_v38 = vpop.xlane.xlu0 %1015 }
 0x3ef   : > { %1856 = vrcp.f32 %v1016_v38 }
 0x3f9   : > { %v1857_v39 = vpop.eup %1856 }
 0x3fa   : > { %v1030_v40 = vmul.f32 %v1857_v39, %v1849_v21 }
 0x3fc   : > { %1718 = vmatpush3.xpose.msk.msra.mxu1 %vm989_vm6, %v1030_v40 }
 0x3fd   : > { %1727 = vmatprep.subr.mxu1 %v1965_v50 }
 0x3ff   : > { %1720 = vmatmul.mubr.msk.f32.vlgmr.msra.gmra.mrb[4].mxu1 %vm989_vm6, %v1034_v41 }
 0x400   : > { %1729 = vmatprep.mubr.msk.f32.mxu1 %vm1964_vm3, %v1965_v50 }
 0x460   : > { %v1019_v42 = vpop.xlane.xlu1 %1018 }
 0x461   : > { %1858 = vrcp.f32 %v1019_v42 }
 0x464   : > { %v1022_v43 = vpop.xlane.xlu0 %1021  ;;  %v1025_v44 = vpop.xlane.xlu1 %1024 }
 0x465   : > { %1860 = vrcp.f32 %v1022_v43 }
 0x466   : > { %1862 = vrcp.f32 %v1025_v44 }
 0x46b   : > { %v1859_v45 = vpop.eup %1858 }
 0x46c   : > { %v1031_v46 = vmul.f32 %v1859_v45, %v1851_v32 }
 0x46e   : > { %1723 = vmatpush3.xpose.msk.msra.mxu0 %vm989_vm6, %v1031_v46 }
 0x46f   : > { %v1861_v49 = vpop.eup %1860  ;;  %1732 = vmatprep.subr.mxu0 %v1965_v50 }
 0x470   : > { %v1863_v51 = vpop.eup %1862  ;;  %v1032_v53 = vmul.f32 %v1861_v49, %v1855_v35 }
 0x471   : > { %v1033_v54 = vmul.f32 %v1863_v51, %v1853_v34  ;;  %1725 = vmatmul.mubr.msk.f32.vlgmr.msra.gmra.mrb[6].mxu0 %vm989_vm6, %v1035_v48 }
 0x472   : > { %1728 = vmatpush3.xpose.msk.msra.mxu1 %vm989_vm6, %v1032_v53  ;;  %1734 = vmatprep.mubr.msk.f32.mxu0 %vm1964_vm3, %v1965_v50 }
 0x473   : > { %1733 = vmatpush3.xpose.msk.msra.mxu0 %vm989_vm6, %v1033_v54  ;;  %1760 = vmatprep.subr.bf16.mxu1 %v1963_v47 }
 0x475   : > { %1730 = vmatmul.mubr.msk.f32.vlgmr.msra.gmra.mrb[6].mxu1 %vm989_vm6, %v1036_v55 }
 0x476   : > { %1735 = vmatmul.mubr.msk.f32.vlgmr.msra.gmra.mrb[8].mxu0 %vm989_vm6, %v1037_v56  ;;  %1745 = vmatprep.mubr.msk.f32.mxu1 %vm1964_vm3, %v1965_v50 }
 0x477   : > { %1762 = vmatpush3.bf16.msra.mxu1 %v1761_v60 }
 0x478   : > { %1763 = vmatprep.subr.bf16.mxu1 %v1963_v47  ;;  %v1624_v47 = vld [vmem:[%s2360_s7] ss:$0 sm:$0xff] }
 0x47b   : > { %1765 = vmatpush3.bf16.msra.mxu1 %v1764_v62 }
 0x4d2   : > { %v1110_v50 = vpop.f32.mrb[4].mxu1 }
 0x4d3   : > { %1342 = vxpose.xlu0.b32.start [1/4] (short) (narrow) %v1110_v50, 8  ;;  %v1721_v63 = vpop.f32.mrb[5].mxu1 }
 0x544   : > { %v1186_v0 = vpop.f32.mrb[6].mxu0 }
 0x545   : > { %1343 = vxpose.xlu0.b32.cont [2/4] (short) (narrow) %v1186_v0, 8  ;;  %v1726_v1 = vpop.f32.mrb[7].mxu0 }
 0x548   : > { %v1262_v2 = vpop.f32.mrb[6].mxu1 }
 0x549   : > { %v1731_v3 = vpop.f32.mrb[7].mxu1  ;;  %1344 = vxpose.xlu0.b32.cont [3/4] (short) (narrow) %v1262_v2, 8  ;;  %v1338_v4 = vpop.f32.mrb[8].mxu0 }
 0x54a   : > { %v1736_v5 = vpop.f32.mrb[9].mxu0 }
 0x54d   : > { %1345 = vxpose.xlu0.b32.end [4/4] (short) (narrow) %v1338_v4, 8 }
 0x5c1   : > { %v1358_v6 = vpop.trf.xlu0 }
 0x5c2   : > { %1746 = vmatmul.mubr.msk.f32.vlgmr.msra.gmra.mrb[8].mxu1 %vm607_vm4, %v1358_v6 }
 0x695   : > { %v1454_v7 = vpop.f32.mrb[8].mxu1 }
 0x696   : > { %v1455_v8 = vadd.f32 %v1624_v47, %v1454_v7  ;;  %v1747_v9 = vpop.f32.mrb[9].mxu1 }
 0x698   : > { %v1458_v10 = vadd.f32 %v1455_v8, %v2206_v52 }
 0x69a   : > { %v1459_v11 = vsel %vm607_vm4, %v1458_v10, 0.0 }
 0x69b   : > { %1460 = vadd.xlane.f32.xlu1 %v1459_v11 }
 0x728   : > { %v1461_v12 = vpop.xlane.xlu1 %1460 }
 0x729   : > { %v1463_v13 = vmul.f32 0.03125, %v1461_v12 }
 0x72b   : > { %v1464_v14 = vsub.f32 %v1458_v10, %v1463_v13 }
 0x72d   : > { %v1465_v15 = vmul.f32 %v1464_v14, %v1464_v14 }
 0x72f   : > { %v1466_v16 = vsel %vm607_vm4, %v1465_v15, 0.0 }
 0x730   : > { %1467 = vadd.xlane.f32.xlu1 %v1466_v16 }
 0x7bd   : > { %v1468_v17 = vpop.xlane.xlu1 %1467 }
 0x7be   : > { %v1469_v18 = vmul.f32 0.03125, %v1468_v17 }
 0x7c0   : > { %v1470_v19 = vadd.f32 1e-12, %v1469_v18 }
 0x7c2   : > { %1864 = vrsqrt.f32 %v1470_v19 }
 0x7cc   : > { %v1865_v52 = vpop.eup %1864 }
 0x7cd   : > { %v1472_v21 = vmul.f32 %v1865_v52, %v1464_v14 }
 0x7cf   : > { %v1480_v23 = vmul.f32 %v1626_v20, %v1472_v21 }
 0x7d1   : > { %v1488_v24 = vadd.f32 %v1627_v22, %v1480_v23 }
 0x7d3   : > { %1489 = vst.msk [vmem:[%s2384_s16] sm:$0xff] %vm607_vm4, %v1488_v24 }
 0x7d4   : > { %1879 = shalt.err (!%p1876_p7)
}
 0x7d5   : > { %s1880_s21 = scalar_lea.hbm %s2295_s17, 128  ;;  %s1884_s27 = scalar_lea.hbm %s2363_s10, 512 }
 0x7d6   : > { %p1881_p9 = scmp.ne.s32.totalorder %s2295_s17, %s1880_s21  ;;  %p1885_p12 = scmp.lt.u32.totalorder %s2295_s17, %s2363_s10 }
 0x7d7   : > { %p1886_p13 = scmp.lt.u32.totalorder %s1884_s27, %s1880_s21  ;;  %p1888_p1 = scmp.lt.u32.totalorder %s1880_s21, %s2295_s17 }
 0x7d8   : > { %p1882_p10 = pnand %p1881_p9, %p2076_p3 }
 0x7d9   : > { %p1887_p0 = por %p1886_p13, %p1885_p12 }
 0x7da   : > { %p1883_p11 = pneg %p1882_p10 }
 0x7db   : > { %p1889_p2 = por %p1888_p1, %p1887_p0 }
 0x7dd   : > { %p1890_p4 = pnand %p1889_p2, %p1883_p11 }
 0x7df   : > { %1893 = shalt.err (!%p1890_p4)
}
 0x7e0   : > { %1768 = dma.vmem_to_hbm [thread:$0]  (%p2076_p3), %s2297_s25, 128, %s2295_s17, %s1491_s28  }
 0x7e1 PF: > { %p1774_p5 = scmp.ge.s32.totalorder %s1960_s20, 2  ;;  %s1518_s19 = sand.u32 1, %s1932_s13  }
 0x7e2   : > { %s1519_s16 = scalar_lea.sflag [#allocation5], %s1518_s19 }
 0x7e3   : > { %p1771_p6 = pnand %p1774_p5, %p2085_p8 }
 0x7e5   : > { %1927 = dma.done.wait (!%p1771_p6), %s1519_s16, 128  }
 0x7e6   : > { %1929 = vsyncadd (!%p1771_p6), %s1519_s16, 4294967168  ;;  %s23_s20 = sadd.s32 1, %s1960_s20   ;;  %s2387_s12 = sld [smem:[#allocation7_spill]] }
 0x7e7   : > { %p20_p7 = scmp.ge.s32.totalorder %s23_s20, 6   ;;  %s2388_s15 = sld [smem:[#allocation13_spill]] }
 0x7e8   : > { %s2389_s16 = sld [smem:[#allocation8_spill]]  ;;  %s2390_s17 = sld [smem:[#allocation9_spill]] }
 0x7e9   : > { %s2391_s18 = sld [smem:[#allocation10_spill]]  ;;  %s2392_s19 = sld [smem:[#allocation11_spill]] }
 0x7ea   : > { %s2393_s13 = smov %s1936_s14  ;;  %22 = sbr.rel (!%p20_p7) target bundleno = 7 (0x7), region = 103 }
 0x7ec   : > { %s2394_s14 = smov %s2387_s12 }
 0x7f1   :  { %1524 = vsyncpa [#allocation5], 1 }
 0x7f2   :  { %1526 = vsyncpa [#allocation5 + $0x1], 1 }

// kernel: tpu_custom_call.1
= control target key start
LH: loop header
LB: loop body
LE: loop exit
PB: predicated region body
PF: predicated region fallthrough
CT: control target
= control target key end

     0   :  { %s2353_s0 = inlined_call_operand.vmem [shape: f32[2,16,32], index: 0, kind: input, shape index: {}]   ;;  %s2354_s1 = inlined_call_operand.vmem [shape: f32[2,1,16], index: 1, kind: input, shape index: {}]   ;;  %s2355_s2 = inlined_call_operand.vmem [shape: f32[32,32], index: 2, kind: input, shape index: {}]   ;;  %s2356_s3 = inlined_call_operand.vmem [shape: f32[1,32], index: 3, kind: input, shape index: {}]   ;;  %s2357_s4 = inlined_call_operand.vmem [shape: f32[64,32], index: 4, kind: input, shape index: {}]   ;;  %s2358_s5 = inlined_call_operand.vmem [shape: f32[64,1], index: 5, kind: input, shape index: {}]   ;;  %s2359_s6 = inlined_call_operand.vmem [shape: f32[32,32], index: 6, kind: input, shape index: {}]   ;;  %s2360_s7 = inlined_call_operand.vmem [shape: f32[1,32], index: 7, kind: input, shape index: {}]   ;;  %s2361_s8 = inlined_call_operand.vmem [shape: f32[1,32], index: 8, kind: input, shape index: {}]   ;;  %s2362_s9 = inlined_call_operand.vmem [shape: f32[1,32], index: 9, kind: input, shape index: {}]   ;;  %s2363_s10 = inlined_call_operand.hbm [shape: f32[2,16,32], index: 10, kind: output, shape index: {}]  }
   0x1   :  { %2371 = sst [smem:[#allocation14_spill]] %s2353_s0 }
   0x2   :  { %15 = vsyncpa [#allocation5], 0 }
   0x3   :  { %17 = vsyncpa [#allocation5 + $0x1], 0  ;;  %s2025_s13 = smov 0   ;;  %s2027_s14 = smov 0  }
   0x4   :  { %s2029_s15 = smov 0   ;;  %s2031_s16 = smov 0  }
   0x5   :  { %s2033_s17 = smov 0   ;;  %s2035_s18 = smov 0  }
   0x6   :  { %s2037_s19 = smov 0   ;;  %s2039_s20 = smov 0  }
   0x7 LB: > { %2372 = sst [smem:[#allocation7_spill]] %s1940_s15  ;;  %s1589_s21 = sadd.s32 4294967295, %s1960_s20   ;;  %s1960_s20 = sphi %s2039_s20, %s23_s20   ;;  %s1956_s19 = sphi %s2037_s19, %s2392_s19   ;;  %s1952_s18 = sphi %s2035_s18, %s2391_s18   ;;  %s1948_s17 = sphi %s2033_s17, %s2390_s17   ;;  %s1944_s16 = sphi %s2031_s16, %s2389_s16   ;;  %s1940_s15 = sphi %s2029_s15, %s2388_s15   ;;  %s1936_s14 = sphi %s2027_s14, %s2394_s14   ;;  %s1932_s13 = sphi %s2025_s13, %s2393_s13  }
   0x8   : > { %2373 = sst [smem:[#allocation8_spill]] %s1952_s18  ;;  %s1590_s22 = sadd.s32 4294967294, %s1960_s20  }
   0x9   : > { %2374 = sst [smem:[#allocation9_spill]] %s1956_s19  ;;  %s32_s23 = sadd.s32 1, %s1952_s18 }
   0xa   : > { %p33_p0 = scmp.ge.s32.totalorder %s32_s23, 2  ;;  %s35_s24 = sadd.s32 1, %s1956_s19 }
   0xb   : > { %p274_p1 = scmp.ne.s32.totalorder %s1940_s15, %s1936_s14  ;;  %p275_p2 = scmp.eq.s32.totalorder %s1589_s21, 3 }
   0xc   : > { %s2396_s23 = smov (%p33_p0, %s32_s23), 0  ;;  %s2398_s24 = smov (!%p33_p0, %s35_s24), %s1956_s19 }
   0xd   : > { %2375 = sst [smem:[#allocation10_spill]] %s2396_s23  ;;  %s260_s25 = ssub.s32 %s1952_s18, %s2396_s23 }
   0xe   : > { %p2076_p3 = por %p275_p2, %p274_p1  ;;  %p37_p4 = scmp.ge.s32.totalorder %s2398_s24, 2 }
   0xf   : > { %p280_p5 = scmp.ne.s32.totalorder %s1936_s14, %s1932_s13  ;;  %p281_p6 = scmp.eq.s32.totalorder %s1590_s22, 3 }
  0x10   : > { %p1593_p7 = scmp.ge.s32.totalorder %s1960_s20, 1  ;;  %s2400_s24 = smov (%p37_p4, %s2398_s24), 0 }
  0x11   : > { %2377 = sst [smem:[#allocation11_spill]] %s2400_s24  ;;  %p2085_p8 = por %p281_p6, %p280_p5 }
  0x12   : > { %p337_p9 = scmp.lt.s32.totalorder %s1960_s20, 5  ;;  %s259_s28 = ssub.s32 %s1956_s19, %s2400_s24 }
  0x13   : > { %s2378_s27 = scalar_select %p2085_p8, 1, 0 }
  0x14   : > { %s264_s29 = sadd.s32 1, %s1940_s15  ;;  %s261_s30 = sor.u32 %s260_s25, %s259_s28 }
  0x15   : > { %2379 = sst [smem:[#allocation12_spill]] %s2378_s27  ;;  %p338_p10 = pnand %p1593_p7, %p337_p9 }
  0x16   : > { %p262_p11 = scmp.eq.s32.totalorder %s261_s30, 0  ;;  %s2368_s12 = sand.u32 (!%p338_p10), 1, %s1936_s14  }
  0x17   : > { %341 = sbr.rel (%p338_p10) target bundleno = 2017 (0x7e1), region = 60  ;;  %p378_p12 = scmp.lt.s32.totalorder (!%p338_p10), %s1948_s17, 1 }
  0x18   : > { %s2094_s11 = scalar_select %p262_p11, %s1940_s15, %s264_s29  }
  0x19   : > { %s2100_s21 = sshll.u32 (!%p338_p10), %s2368_s12, 3  ;;  %s2381_s0 = sld [smem:[#allocation14_spill]] (!%p338_p10) }
  0x1a   : > { %2380 = sst [smem:[#allocation13_spill]] %s2094_s11  ;;  %p1597_p13 = scmp.ne.s32.totalorder (!%p338_p10), %s1944_s16, 0 }
  0x1e   : > { %s2103_s22 = scalar_select %p378_p12, %s1948_s17, 1 }
  0x1f   : > { %389 = sbr.rel (%p1597_p13) target bundleno = 265 (0x109), region = 64  ;;  %vm448_vm0 = vcmask (!%p1597_p13), 261120   ;;  %v392_v2 = vld [vmem:[%s2357_s4] sm:$0xff] (!%p1597_p13)  ;;  %v1962_v5 = vmov (!%p1597_p13), 0   ;;  %v402_v6 = vld [vmem:[%s2358_s5 + $0x10] sm:$0xff] (!%p1597_p13)  ;;  %v403_v8 = vld [vmem:[%s2358_s5 + $0x18] sm:$0xff] (!%p1597_p13) }
  0x20   : > { %s1633_s25 = sshll.u32 %s2103_s22, 4  ;;  %vm1749_vm1 = vmpackc.low (!%p1597_p13), %vm448_vm0, %vm448_vm0  ;;  %1674 = vmatprep.mubr.msk.f32.mxu0 (!%p1597_p13), %vm448_vm0, %v392_v2  ;;  %v396_v4 = vld [vmem:[%s2357_s4 + $0x20] sm:$0xff] (!%p1597_p13)  ;;  %1847 = vset.pattern.permute.xlu1 (!%p1597_p13), %v1962_v5  ;;  %v401_v9 = vld [vmem:[%s2358_s5 + $0x8] sm:$0xff] (!%p1597_p13)  ;;  %vm584_vm2 = vcmask (!%p1597_p13), 130048  }
  0x21   : > { %s2113_s19 = scalar_lea.vmem %s2381_s0, %s1633_s25  ;;  %1680 = vmatprep.mubr.msk.f32.mxu1 (!%p1597_p13), %vm448_vm0, %v396_v4  ;;  %1846 = vset.pattern.permute.xlu0 (!%p1597_p13), %v1962_v5  ;;  %v400_v7 = vld [vmem:[%s2358_s5] sm:$0xff] (!%p1597_p13)  ;;  %v393_v10 = vld [vmem:[%s2357_s4 + $0x8] sm:$0xff] (!%p1597_p13)  ;;  %v394_v12 = vld [vmem:[%s2357_s4 + $0x10] sm:$0xff] (!%p1597_p13) }
  0x22   : > { %v390_v0 = vld [vmem:[%s2113_s19] sm:$0xff] (!%p1597_p13)  ;;  %v391_v1 = vld [vmem:[%s2113_s19 + $0x8] sm:$0xff] (!%p1597_p13)  ;;  %420 = vperm.xlu1 (!%p1597_p13), %1847, %v402_v6   ;;  %410 = vperm.xlu0 (!%p1597_p13), %1846, %v400_v7   ;;  %v398_v13 = vld [vmem:[%s2357_s4 + $0x30] sm:$0xff] (!%p1597_p13) }
  0x23   : > { %v1748_v3 = vpack.c.bf16 (!%p1597_p13), %v391_v1, %v390_v0  ;;  %v397_v11 = vld [vmem:[%s2357_s4 + $0x28] sm:$0xff] (!%p1597_p13)  ;;  %v404_v15 = vld [vmem:[%s2358_s5 + $0x20] sm:$0xff] (!%p1597_p13)  ;;  %v395_v16 = vld [vmem:[%s2357_s4 + $0x18] sm:$0xff] (!%p1597_p13) }
  0x24   : > { %v405_v14 = vld [vmem:[%s2358_s5 + $0x28] sm:$0xff] (!%p1597_p13)  ;;  %v399_v17 = vld [vmem:[%s2357_s4 + $0x38] sm:$0xff] (!%p1597_p13)  ;;  %v406_v19 = vld [vmem:[%s2358_s5 + $0x30] sm:$0xff] (!%p1597_p13) }
  0x25   : > { %1750 = vmatprep.subr.msk.bf16.mxu0 (!%p1597_p13), %vm1749_vm1, %v1748_v3  ;;  %1766 = vmatprep.subr.msk.bf16.mxu1 (!%p1597_p13), %vm1749_vm1, %v1748_v3  ;;  %v407_v18 = vld [vmem:[%s2358_s5 + $0x38] sm:$0xff] (!%p1597_p13) }
  0x26   : > { %1753 = vmatpush3.bf16.xpose.msk.msra.mxu0 %vm1749_vm1, %v1748_v3  ;;  %1767 = vmatpush3.bf16.xpose.msk.msra.mxu1 %vm1749_vm1, %v1748_v3 }
  0x27   : > { %425 = vperm.xlu1 %1847, %v403_v8   ;;  %415 = vperm.xlu0 %1846, %v401_v9  }
  0x2b   : > { %435 = vperm.xlu1 %1847, %v405_v14   ;;  %430 = vperm.xlu0 %1846, %v404_v15  }
  0x2d   : > { %1675 = vmatmul.mubr.msk.f32.vlgmr.msra.gmra.mrb[0].mxu0 %vm448_vm0, %v393_v10  ;;  %1681 = vmatmul.mubr.msk.f32.vlgmr.msra.gmra.mrb[0].mxu1 %vm448_vm0, %v397_v11 }
  0x2e   : > { %1677 = vmatprep.mubr.msk.f32.mxu0 %vm448_vm0, %v394_v12  ;;  %1683 = vmatprep.mubr.msk.f32.mxu1 %vm448_vm0, %v398_v13 }
  0x2f   : > { %445 = vperm.xlu1 %1847, %v407_v18   ;;  %440 = vperm.xlu0 %1846, %v406_v19  }
  0x31   : > { %1678 = vmatmul.mubr.msk.f32.gmra.mrb[2].mxu0 %vm448_vm0, %v395_v16  ;;  %1684 = vmatmul.mubr.msk.f32.gmra.mrb[2].mxu1 %vm448_vm0, %v399_v17 }
  0xa1   : > { %v421_v20 = vpop.permute.xlu1 %420  ;;  %v411_v21 = vpop.permute.xlu0 %410 }
  0xa6   : > { %v426_v22 = vpop.permute.xlu1 %425  ;;  %v416_v23 = vpop.permute.xlu0 %415 }
  0xaa   : > { %v436_v24 = vpop.permute.xlu1 %435  ;;  %v431_v25 = vpop.permute.xlu0 %430 }
  0xae   : > { %v446_v34 = vpop.permute.xlu1 %445  ;;  %v441_v35 = vpop.permute.xlu0 %440 }
 0x100   : > { %v1676_v26 = vpop.f32.mrb[0].mxu0  ;;  %v1682_v27 = vpop.f32.mrb[0].mxu1 }
 0x101   : > { %v551_v28 = vadd.f32 %v1676_v26, %v416_v23  ;;  %v571_v29 = vadd.f32 %v1682_v27, %v436_v24  ;;  %v545_v30 = vpop.f32.mrb[1].mxu0  ;;  %v565_v31 = vpop.f32.mrb[1].mxu1 }
 0x102   : > { %v546_v32 = vadd.f32 %v545_v30, %v411_v21  ;;  %v566_v33 = vadd.f32 %v565_v31, %v431_v25 }
 0x103   : > { %586 = vst.msk [vmem:[#allocation2 + $0x8] sm:$0xff] %vm584_vm2, %v551_v28  ;;  %590 = vst.msk [vmem:[#allocation3 + $0x8] sm:$0xff] %vm584_vm2, %v571_v29 }
 0x104   : > { %585 = vst.msk [vmem:[#allocation2] sm:$0xff] %vm584_vm2, %v546_v32  ;;  %589 = vst.msk [vmem:[#allocation3] sm:$0xff] %vm584_vm2, %v566_v33  ;;  %v1679_v36 = vpop.f32.mrb[2].mxu0  ;;  %v1685_v37 = vpop.f32.mrb[2].mxu1 }
 0x105   : > { %v561_v38 = vadd.f32 %v1679_v36, %v426_v22  ;;  %v581_v39 = vadd.f32 %v1685_v37, %v446_v34  ;;  %v555_v40 = vpop.f32.mrb[3].mxu0  ;;  %v575_v41 = vpop.f32.mrb[3].mxu1 }
 0x106   : > { %v556_v42 = vadd.f32 %v555_v40, %v421_v20  ;;  %v576_v43 = vadd.f32 %v575_v41, %v441_v35 }
 0x107   : > { %588 = vst.msk [vmem:[#allocation2 + $0x18] sm:$0xff] %vm584_vm2, %v561_v38  ;;  %592 = vst.msk [vmem:[#allocation3 + $0x18] sm:$0xff] %vm584_vm2, %v581_v39 }
 0x108   : > { %587 = vst.msk [vmem:[#allocation2 + $0x10] sm:$0xff] %vm584_vm2, %v556_v42  ;;  %591 = vst.msk [vmem:[#allocation3 + $0x10] sm:$0xff] %vm584_vm2, %v576_v43 }
 0x109 PF: > { %v596_v44 = vld [vmem:[%s2355_s2] sm:$0xff]  ;;  %v597_v45 = vld [vmem:[%s2355_s2 + $0x8] sm:$0xff]  ;;  %v598_v46 = vld [vmem:[%s2355_s2 + $0x10] sm:$0xff]  ;;  %v1963_v47 = vmov 0.0|0.0   ;;  %vm1964_vm3 = vmmov 0   ;;  %v1965_v50 = vmov 0.0   ;;  %s2382_s15 = scalar_lea.vmem %s2354_s1, %s2103_s22 }
 0x10a   : > { %1754 = vmatprep.subr.bf16.mxu0 %v1963_v47  ;;  %v1755_v48 = vpack.c.bf16 %v597_v45, %v596_v44  ;;  %v599_v49 = vld [vmem:[%s2355_s2 + $0x18] sm:$0xff]  ;;  %1694 = vmatprep.mubr.msk.f32.mxu0 %vm1964_vm3, %v1965_v50  ;;  %s1608_s25 = sshll.u32 %s1944_s16, 3  ;;  %vm607_vm4 = vcmask 261120   ;;  %v690_v54 = vld [vmem:[#allocation2 + $0x8] sm:$0xff]  ;;  %v1609_v55 = vld [vmem:[%s2356_s3] ss:$0 sm:$0xff] }
 0x10b   : > { %1702 = vmatprep.subr.mxu1 %v1965_v50  ;;  %1704 = vmatprep.mubr.msk.f32.mxu1 %vm1964_vm3, %v1965_v50  ;;  %v1758_v51 = vpack.c.bf16 %v599_v49, %v598_v46  ;;  %s594_s11 = scalar_lea.vmem %s2113_s19, %s1608_s25  ;;  %v689_v53 = vld [vmem:[#allocation2] sm:$0xff]  ;;  %vm700_vm5 = vcmask 64512   ;;  %s1966_s28 = smov 104   ;;  %vm989_vm6 = vcmask 130048  }
 0x10c   : > { %1756 = vmatpush3.bf16.msra.mxu0 %v1755_v48  ;;  %v2206_v52 = vld [vmem:[%s594_s11] sm:$0xff]  ;;  %1703 = vmatpush3.msra.mxu1 %v690_v54  ;;  %s1967_s18 = smov 120   ;;  %s1968_s30 = smov 112   ;;  %v1035_v48 = vld [vmem:[#allocation3 + $0x8] sm:$0xff] }
 0x10d   : > { %1757 = vmatprep.subr.bf16.mxu0 %v1963_v47  ;;  %1707 = vmatprep.subr.mxu1 %v1965_v50  ;;  %v1611_v1 = vld [vmem:[%s2382_s15] ss:$0 sm:$0xff]  ;;  %s2383_s24 = scalar_lea.vmem [#allocation4], %s2100_s21  ;;  %s2385_s12 = sand.u32 1, %s1936_s14  }
 0x10e   : > { %v692_v60 = vld [vmem:[#allocation2 + $0x18] sm:$0xff]  ;;  %v1034_v41 = vld [vmem:[#allocation3] sm:$0xff]  ;;  %s1506_s25 = sshll.u32 %s2383_s24, 4  ;;  %s2297_s25 = int_to_ptr.vmem [resolvable:$true] %s1506_s25 }
 0x10f   : > { %v691_v61 = vld [vmem:[#allocation2 + $0x10] sm:$0xff] }
 0x110   : > { %1759 = vmatpush3.bf16.msra.mxu0 %v1758_v51 }
 0x111   : > { %1697 = vmatprep.subr.mxu0 %v1965_v50 }
 0x113   : > { %1695 = vmatmul.mubr.msk.f32.vlgmr.msra.gmra.mrb[0].mxu0 %vm607_vm4, %v2206_v52 }
 0x114   : > { %1699 = vmatprep.mubr.msk.f32.mxu0 %vm1964_vm3, %v1965_v50  ;;  %1698 = vmatpush3.msra.mxu0 %v689_v53 }
 0x115   : > { %1712 = vmatprep.subr.mxu0 %v1965_v50 }
 0x1e6   : > { %v677_v56 = vpop.f32.mrb[0].mxu0 }
 0x1e7   : > { %v678_v57 = vadd.f32 %v1609_v55, %v677_v56  ;;  %v1696_v58 = vpop.f32.mrb[1].mxu0  ;;  %v1036_v55 = vld [vmem:[#allocation3 + $0x10] sm:$0xff]  ;;  %v1037_v56 = vld [vmem:[#allocation3 + $0x18] sm:$0xff] }
 0x1e8   : > { %v1375_v58 = vld [vmem:[%s2359_s6 + $0x8] sm:$0xff] }
 0x1e9   : > { %v681_v59 = vmul.f32 0.35355338, %v678_v57  ;;  %v1374_v57 = vld [vmem:[%s2359_s6] sm:$0xff] }
 0x1eb   : > { %687 = vrot.lane.b32.xlu1 %v681_v59, %s1966_s28  ;;  %683 = vrot.lane.b32.xlu0 %v681_v59, %s1967_s18  ;;  %s1491_s28 = scalar_lea.sflag [#allocation5], %s2385_s12  ;;  %s1866_s18 = scalar_lea.vmem %s2297_s25, 128 }
 0x1ec   : > { %1700 = vmatmul.mubr.msk.f32.vlgmr.msra.gmra.mrb[2].mxu0 %vm700_vm5, %v681_v59  ;;  %p1867_p0 = scmp.ne.s32.totalorder %s2297_s25, %s1866_s18 }
 0x1ed   : > { %1713 = vmatpush3.msra.mxu0 %v692_v60  ;;  %1714 = vmatprep.mubr.msk.f32.mxu0 %vm1964_vm3, %v1965_v50  ;;  %v1761_v60 = vpack.c.bf16 %v1375_v58, %v1374_v57 }
 0x1ee   : > { %1722 = vmatprep.subr.mxu0 %v1965_v50  ;;  %p1868_p1 = pnand %p1867_p0, %p2076_p3 }
 0x1ef   : > { %685 = vrot.lane.b32.xlu0 %v681_v59, %s1968_s30  ;;  %v1376_v59 = vld [vmem:[%s2359_s6 + $0x10] sm:$0xff]  ;;  %s1629_s30 = sshll.u32 %s1948_s17, 1 }
 0x1f0   : > { %s1502_s0 = sadd.s32 %s1944_s16, %s1629_s30  ;;  %s2384_s16 = smov %s2383_s24 }
 0x1f1   : > { %s1630_s23 = sshll.u32 %s1502_s0, 7  ;;  %p1869_p2 = pneg %p1868_p1 }
 0x1f2   : > { %s2295_s17 = scalar_lea.hbm %s2363_s10, %s1630_s23  ;;  %s1969_s30 = smov [#allocation4]  }
 0x1f3   : > { %s1870_s0 = sshll.u32 %s1969_s30, 4  ;;  %s1871_s0 = int_to_ptr.vmem [resolvable:$false] %s1870_s0 }
 0x1f4   : > { %s1872_s29 = scalar_lea.vmem %s1871_s0, 256  ;;  %p1873_p4 = scmp.lt.s32.totalorder %s2297_s25, %s1871_s0 }
 0x1f5   : > { %p1874_p5 = scmp.lt.s32.totalorder %s1872_s29, %s1866_s18 }
 0x1f7   : > { %p1875_p6 = por %p1874_p5, %p1873_p4 }
 0x1f9   : > { %p1876_p7 = pnand %p1875_p6, %p1869_p2 }
 0x25d   : > { %v688_v62 = vpop.permute.xlu1 %687  ;;  %v684_v63 = vpop.permute.xlu0 %683 }
 0x25e   : > { %1705 = vmatmul.mubr.msk.f32.vlgmr.msra.gmra.mrb[0].mxu1 %vm700_vm5, %v684_v63  ;;  %1715 = vmatmul.mubr.msk.f32.vlgmr.msra.gmra.mrb[4].mxu0 %vm700_vm5, %v688_v62 }
 0x25f   : > { %1708 = vmatpush3.msra.mxu1 %v691_v61  ;;  %1709 = vmatprep.mubr.msk.f32.mxu1 %vm1964_vm3, %v1965_v50  ;;  %v1377_v61 = vld [vmem:[%s2359_s6 + $0x18] sm:$0xff] }
 0x260   : > { %1717 = vmatprep.subr.mxu1 %v1965_v50  ;;  %1724 = vmatprep.mubr.msk.f32.mxu0 %vm1964_vm3, %v1965_v50  ;;  %v1764_v62 = vpack.c.bf16 %v1377_v61, %v1376_v59 }
 0x261   : > { %v686_v0 = vpop.permute.xlu0 %685 }
 0x262   : > { %1710 = vmatmul.mubr.msk.f32.vlgmr.msra.gmra.mrb[2].mxu1 %vm700_vm5, %v686_v0 }
 0x263   : > { %1719 = vmatprep.mubr.msk.f32.mxu1 %vm1964_vm3, %v1965_v50 }
 0x2bf   : > { %v769_v2 = vpop.f32.mrb[2].mxu0 }
 0x2c0   : > { %v770_v3 = vadd.f32 %v1611_v1, %v769_v2  ;;  %v1701_v4 = vpop.f32.mrb[3].mxu0 }
 0x2c2   : > { %v990_v5 = vsel %vm989_vm6, %v770_v3, -inf }
 0x2c3   : > { %991 = vmax.xlane.f32.xlu1 %v990_v5 }
 0x331   : > { %v841_v6 = vpop.f32.mrb[0].mxu1  ;;  %v985_v7 = vpop.f32.mrb[4].mxu0 }
 0x332   : > { %v842_v8 = vadd.f32 %v1611_v1, %v841_v6  ;;  %v986_v9 = vadd.f32 %v1611_v1, %v985_v7  ;;  %v1706_v10 = vpop.f32.mrb[1].mxu1  ;;  %v1716_v11 = vpop.f32.mrb[5].mxu0 }
 0x334   : > { %v993_v12 = vsel %vm989_vm6, %v842_v8, -inf  ;;  %v999_v13 = vsel %vm989_vm6, %v986_v9, -inf }
 0x335   : > { %994 = vmax.xlane.f32.xlu0 %v993_v12  ;;  %v913_v14 = vpop.f32.mrb[2].mxu1  ;;  %1000 = vmax.xlane.f32.xlu1 %v999_v13 }
 0x336   : > { %v914_v15 = vadd.f32 %v1611_v1, %v913_v14  ;;  %v1711_v16 = vpop.f32.mrb[3].mxu1 }
 0x338   : > { %v996_v17 = vsel %vm989_vm6, %v914_v15, -inf }
 0x339   : > { %997 = vmax.xlane.f32.xlu0 %v996_v17 }
 0x350   : > { %v992_v18 = vpop.xlane.xlu1 %991 }
 0x351   : > { %v1002_v19 = vsub.f32 %v770_v3, %v992_v18 }
 0x353   : > { %v1006_v20 = vmul.f32 1.442695, %v1002_v19 }
 0x355   : > { %1848 = vpow2.f32 %v1006_v20  ;;  %v1626_v20 = vld [vmem:[%s2361_s8] ss:$0 sm:$0xff] }
 0x35f   : > { %v1849_v21 = vpop.eup %1848 }
 0x360   : > { %v1014_v22 = vsel %vm989_vm6, %v1849_v21, 0.0 }
 0x361   : > { %1015 = vadd.xlane.f32.xlu0 %v1014_v22  ;;  %v1627_v22 = vld [vmem:[%s2362_s9] ss:$0 sm:$0xff] }
 0x3c2   : > { %v995_v23 = vpop.xlane.xlu0 %994  ;;  %v1001_v24 = vpop.xlane.xlu1 %1000 }
 0x3c3   : > { %v1003_v25 = vsub.f32 %v842_v8, %v995_v23  ;;  %v1005_v26 = vsub.f32 %v986_v9, %v1001_v24 }
 0x3c5   : > { %v1008_v27 = vmul.f32 1.442695, %v1003_v25  ;;  %v1012_v28 = vmul.f32 1.442695, %v1005_v26 }
 0x3c6   : > { %v998_v29 = vpop.xlane.xlu0 %997 }
 0x3c7   : > { %1850 = vpow2.f32 %v1008_v27  ;;  %v1004_v30 = vsub.f32 %v914_v15, %v998_v29 }
 0x3c8   : > { %1852 = vpow2.f32 %v1012_v28 }
 0x3c9   : > { %v1010_v31 = vmul.f32 1.442695, %v1004_v30 }
 0x3cb   : > { %1854 = vpow2.f32 %v1010_v31 }
 0x3d1   : > { %v1851_v32 = vpop.eup %1850 }
 0x3d2   : > { %v1017_v33 = vsel %vm989_vm6, %v1851_v32, 0.0  ;;  %v1853_v34 = vpop.eup %1852 }
 0x3d3   : > { %1018 = vadd.xlane.f32.xlu1 %v1017_v33  ;;  %v1023_v37 = vsel %vm989_vm6, %v1853_v34, 0.0 }
 0x3d5   : > { %v1855_v35 = vpop.eup %1854 }
 0x3d6   : > { %v1020_v36 = vsel %vm989_vm6, %v1855_v35, 0.0 }
 0x3d7   : > { %1021 = vadd.xlane.f32.xlu0 %v1020_v36  ;;  %1024 = vadd.xlane.f32.xlu1 %v1023_v37 }
 0x3ee   : > { %v1016_v38 = vpop.xlane.xlu0 %1015 }
 0x3ef   : > { %1856 = vrcp.f32 %v1016_v38 }
 0x3f9   : > { %v1857_v39 = vpop.eup %1856 }
 0x3fa   : > { %v1030_v40 = vmul.f32 %v1857_v39, %v1849_v21 }
 0x3fc   : > { %1718 = vmatpush3.xpose.msk.msra.mxu1 %vm989_vm6, %v1030_v40 }
 0x3fd   : > { %1727 = vmatprep.subr.mxu1 %v1965_v50 }
 0x3ff   : > { %1720 = vmatmul.mubr.msk.f32.vlgmr.msra.gmra.mrb[4].mxu1 %vm989_vm6, %v1034_v41 }
 0x400   : > { %1729 = vmatprep.mubr.msk.f32.mxu1 %vm1964_vm3, %v1965_v50 }
 0x460   : > { %v1019_v42 = vpop.xlane.xlu1 %1018 }
 0x461   : > { %1858 = vrcp.f32 %v1019_v42 }
 0x464   : > { %v1022_v43 = vpop.xlane.xlu0 %1021  ;;  %v1025_v44 = vpop.xlane.xlu1 %1024 }
 0x465   : > { %1860 = vrcp.f32 %v1022_v43 }
 0x466   : > { %1862 = vrcp.f32 %v1025_v44 }
 0x46b   : > { %v1859_v45 = vpop.eup %1858 }
 0x46c   : > { %v1031_v46 = vmul.f32 %v1859_v45, %v1851_v32 }
 0x46e   : > { %1723 = vmatpush3.xpose.msk.msra.mxu0 %vm989_vm6, %v1031_v46 }
 0x46f   : > { %v1861_v49 = vpop.eup %1860  ;;  %1732 = vmatprep.subr.mxu0 %v1965_v50 }
 0x470   : > { %v1863_v51 = vpop.eup %1862  ;;  %v1032_v53 = vmul.f32 %v1861_v49, %v1855_v35 }
 0x471   : > { %v1033_v54 = vmul.f32 %v1863_v51, %v1853_v34  ;;  %1725 = vmatmul.mubr.msk.f32.vlgmr.msra.gmra.mrb[6].mxu0 %vm989_vm6, %v1035_v48 }
 0x472   : > { %1728 = vmatpush3.xpose.msk.msra.mxu1 %vm989_vm6, %v1032_v53  ;;  %1734 = vmatprep.mubr.msk.f32.mxu0 %vm1964_vm3, %v1965_v50 }
 0x473   : > { %1733 = vmatpush3.xpose.msk.msra.mxu0 %vm989_vm6, %v1033_v54  ;;  %1760 = vmatprep.subr.bf16.mxu1 %v1963_v47 }
 0x475   : > { %1730 = vmatmul.mubr.msk.f32.vlgmr.msra.gmra.mrb[6].mxu1 %vm989_vm6, %v1036_v55 }
 0x476   : > { %1735 = vmatmul.mubr.msk.f32.vlgmr.msra.gmra.mrb[8].mxu0 %vm989_vm6, %v1037_v56  ;;  %1745 = vmatprep.mubr.msk.f32.mxu1 %vm1964_vm3, %v1965_v50 }
 0x477   : > { %1762 = vmatpush3.bf16.msra.mxu1 %v1761_v60 }
 0x478   : > { %1763 = vmatprep.subr.bf16.mxu1 %v1963_v47  ;;  %v1624_v47 = vld [vmem:[%s2360_s7] ss:$0 sm:$0xff] }
 0x47b   : > { %1765 = vmatpush3.bf16.msra.mxu1 %v1764_v62 }
 0x4d2   : > { %v1110_v50 = vpop.f32.mrb[4].mxu1 }
 0x4d3   : > { %1342 = vxpose.xlu0.b32.start [1/4] (short) (narrow) %v1110_v50, 8  ;;  %v1721_v63 = vpop.f32.mrb[5].mxu1 }
 0x544   : > { %v1186_v0 = vpop.f32.mrb[6].mxu0 }
 0x545   : > { %1343 = vxpose.xlu0.b32.cont [2/4] (short) (narrow) %v1186_v0, 8  ;;  %v1726_v1 = vpop.f32.mrb[7].mxu0 }
 0x548   : > { %v1262_v2 = vpop.f32.mrb[6].mxu1 }
 0x549   : > { %v1731_v3 = vpop.f32.mrb[7].mxu1  ;;  %1344 = vxpose.xlu0.b32.cont [3/4] (short) (narrow) %v1262_v2, 8  ;;  %v1338_v4 = vpop.f32.mrb[8].mxu0 }
 0x54a   : > { %v1736_v5 = vpop.f32.mrb[9].mxu0 }
 0x54d   : > { %1345 = vxpose.xlu0.b32.end [4/4] (short) (narrow) %v1338_v4, 8 }
 0x5c1   : > { %v1358_v6 = vpop.trf.xlu0 }
 0x5c2   : > { %1746 = vmatmul.mubr.msk.f32.vlgmr.msra.gmra.mrb[8].mxu1 %vm607_vm4, %v1358_v6 }
 0x695   : > { %v1454_v7 = vpop.f32.mrb[8].mxu1 }
 0x696   : > { %v1455_v8 = vadd.f32 %v1624_v47, %v1454_v7  ;;  %v1747_v9 = vpop.f32.mrb[9].mxu1 }
 0x698   : > { %v1458_v10 = vadd.f32 %v1455_v8, %v2206_v52 }
 0x69a   : > { %v1459_v11 = vsel %vm607_vm4, %v1458_v10, 0.0 }
 0x69b   : > { %1460 = vadd.xlane.f32.xlu1 %v1459_v11 }
 0x728   : > { %v1461_v12 = vpop.xlane.xlu1 %1460 }
 0x729   : > { %v1463_v13 = vmul.f32 0.03125, %v1461_v12 }
 0x72b   : > { %v1464_v14 = vsub.f32 %v1458_v10, %v1463_v13 }
 0x72d   : > { %v1465_v15 = vmul.f32 %v1464_v14, %v1464_v14 }
 0x72f   : > { %v1466_v16 = vsel %vm607_vm4, %v1465_v15, 0.0 }
 0x730   : > { %1467 = vadd.xlane.f32.xlu1 %v1466_v16 }
 0x7bd   : > { %v1468_v17 = vpop.xlane.xlu1 %1467 }
 0x7be   : > { %v1469_v18 = vmul.f32 0.03125, %v1468_v17 }
 0x7c0   : > { %v1470_v19 = vadd.f32 1e-12, %v1469_v18 }
 0x7c2   : > { %1864 = vrsqrt.f32 %v1470_v19 }
 0x7cc   : > { %v1865_v52 = vpop.eup %1864 }
 0x7cd   : > { %v1472_v21 = vmul.f32 %v1865_v52, %v1464_v14 }
 0x7cf   : > { %v1480_v23 = vmul.f32 %v1626_v20, %v1472_v21 }
 0x7d1   : > { %v1488_v24 = vadd.f32 %v1627_v22, %v1480_v23 }
 0x7d3   : > { %1489 = vst.msk [vmem:[%s2384_s16] sm:$0xff] %vm607_vm4, %v1488_v24 }
 0x7d4   : > { %1879 = shalt.err (!%p1876_p7)
}
 0x7d5   : > { %s1880_s21 = scalar_lea.hbm %s2295_s17, 128  ;;  %s1884_s27 = scalar_lea.hbm %s2363_s10, 512 }
 0x7d6   : > { %p1881_p9 = scmp.ne.s32.totalorder %s2295_s17, %s1880_s21  ;;  %p1885_p12 = scmp.lt.u32.totalorder %s2295_s17, %s2363_s10 }
 0x7d7   : > { %p1886_p13 = scmp.lt.u32.totalorder %s1884_s27, %s1880_s21  ;;  %p1888_p1 = scmp.lt.u32.totalorder %s1880_s21, %s2295_s17 }
 0x7d8   : > { %p1882_p10 = pnand %p1881_p9, %p2076_p3 }
 0x7d9   : > { %p1887_p0 = por %p1886_p13, %p1885_p12 }
 0x7da   : > { %p1883_p11 = pneg %p1882_p10 }
 0x7db   : > { %p1889_p2 = por %p1888_p1, %p1887_p0 }
 0x7dd   : > { %p1890_p4 = pnand %p1889_p2, %p1883_p11 }
 0x7df   : > { %1893 = shalt.err (!%p1890_p4)
}
 0x7e0   : > { %1768 = dma.vmem_to_hbm [thread:$0]  (%p2076_p3), %s2297_s25, 128, %s2295_s17, %s1491_s28  }
 0x7e1 PF: > { %p1774_p5 = scmp.ge.s32.totalorder %s1960_s20, 2  ;;  %s1518_s19 = sand.u32 1, %s1932_s13  }
 0x7e2   : > { %s1519_s16 = scalar_lea.sflag [#allocation5], %s1518_s19 }
 0x7e3   : > { %p1771_p6 = pnand %p1774_p5, %p2085_p8 }
 0x7e5   : > { %1927 = dma.done.wait (!%p1771_p6), %s1519_s16, 128  }
 0x7e6   : > { %1929 = vsyncadd (!%p1771_p6), %s1519_s16, 4294967168  ;;  %s23_s20 = sadd.s32 1, %s1960_s20   ;;  %s2387_s12 = sld [smem:[#allocation7_spill]] }
 0x7e7   : > { %p20_p7 = scmp.ge.s32.totalorder %s23_s20, 6   ;;  %s2388_s15 = sld [smem:[#allocation13_spill]] }
 0x7e8   : > { %s2389_s16 = sld [smem:[#allocation8_spill]]  ;;  %s2390_s17 = sld [smem:[#allocation9_spill]] }
 0x7e9   : > { %s2391_s18 = sld [smem:[#allocation10_spill]]  ;;  %s2392_s19 = sld [smem:[#allocation11_spill]] }
 0x7ea   : > { %s2393_s13 = smov %s1936_s14  ;;  %22 = sbr.rel (!%p20_p7) target bundleno = 7 (0x7), region = 103 }
 0x7ec   : > { %s2394_s14 = smov %s2387_s12 }
 0x7f1   :  { %1524 = vsyncpa [#allocation5], 1 }
 0x7f2   :  { %1526 = vsyncpa [#allocation5 + $0x1], 1 }

</bundles_post_ra>
